<compile_context>
chip_gen: v7x
topology: tpu7x:2x2x1
jax: 0.10.0
libtpu: 0.0.40
codegen_flags: <defaults>
</compile_context>

<pallas_src>
import jax
import jax.numpy as jnp
from jax.experimental import pallas as pl
from jax.experimental.pallas import tpu as pltpu


def feature_booster_kernel(x_ref, w1_ref, w2_ref, o_ref):
    """One row-tile of the forward pass.

    x_ref  : (TILE_N, D)    input rows
    w1_ref : (D, Hp)        mlp[0].weight^T, zero-padded to lane-dense Hp
    w2_ref : (Hp, D)        mlp[2].weight^T, zero-padded to lane-dense Hp
    o_ref  : (TILE_N, D)    x * sigmoid(mlp(x) + mlp(x))
    """
    x = x_ref[...]

    # scatter(max)/scatter(sum) over batch=arange(N) are identities, so both MLP
    # branches see the same input and weights -> compute once, add to itself.
    h = jnp.maximum(
        jnp.dot(x, w1_ref[...], preferred_element_type=jnp.float32), 0.0
    )
    mlp_out = jnp.dot(h, w2_ref[...], preferred_element_type=jnp.float32)

    y = jax.nn.sigmoid(mlp_out + mlp_out)   # max_out + sum_out
    o_ref[...] = (x * y).astype(o_ref.dtype)


def _round_up(v, m):
    return (v + m - 1) // m * m


def feature_booster_forward(x, w1, w2, *, tile_n=1024):
    """Row-tiled pallas_call wrapper.

    Weights (passed unpadded, stored transposed: w1 (D,H), w2 (H,D)) are
    zero-padded to a multiple-of-128 hidden dim and kept VMEM-resident across
    row tiles. Sweep tile_n per generation: ~512-1024 (v5e), ~1024-2048 (v6e),
    >=2048 (v7x) for large N.
    """
    n, dim = x.shape
    hidden = w1.shape[1]

    # Lane-dense hidden padding (bit-identical: padded columns are 0 after ReLU
    # and contribute 0 to the second matmul).
    hidden_p = max(128, _round_up(hidden, 128))
    if hidden_p != hidden:
        w1 = jnp.pad(w1, ((0, 0), (0, hidden_p - hidden)))
        w2 = jnp.pad(w2, ((0, hidden_p - hidden), (0, 0)))

    # Row tile: as large as possible (HBM-bound), multiple of 8 unless it covers
    # the whole row extent (the (8,128) BlockSpec constraint).
    tile_n = min(tile_n, n)
    if tile_n < n:
        tile_n = max(8, (tile_n // 8) * 8)

    grid = (pl.cdiv(n, tile_n),)

    # Explicit VMEM budget: double-buffered x/out tiles + replicated weights +
    # fused intermediates, clamped to a window safe on v7x (64 MiB physical).
    itemsize = 4
    vmem_need = itemsize * (
        2 * 2 * tile_n * dim          # x + out tiles, double-buffered
        + 2 * 2 * dim * hidden_p      # w1 + w2 (replicated), double-buffered
        + tile_n * hidden_p           # h
        + 2 * tile_n * dim            # mlp_out, y temporaries
    )
    vmem_limit = int(min(max(2 * vmem_need, 32 << 20), 48 << 20))

    cost = pl.CostEstimate(
        flops=4 * n * dim * hidden_p,                       # two matmuls
        transcendentals=n * dim,                            # sigmoid
        bytes_accessed=(2 * n * dim + 2 * dim * hidden_p) * itemsize,
    )

    return pl.pallas_call(
        feature_booster_kernel,
        out_shape=jax.ShapeDtypeStruct((n, dim), x.dtype),
        grid_spec=pltpu.PrefetchScalarGridSpec(
            num_scalar_prefetch=0,
            grid=grid,
            in_specs=[
                pl.BlockSpec((tile_n, dim), lambda i: (i, 0)),    # x row tile
                pl.BlockSpec((dim, hidden_p), lambda i: (0, 0)),  # w1 (replicated)
                pl.BlockSpec((hidden_p, dim), lambda i: (0, 0)),  # w2 (replicated)
            ],
            out_specs=pl.BlockSpec((tile_n, dim), lambda i: (i, 0)),
        ),
        compiler_params=pltpu.CompilerParams(
            dimension_semantics=("parallel",),   # independent row tiles
            vmem_limit_bytes=vmem_limit,
        ),
        cost_estimate=cost,
    )(x, w1, w2)


def init_params(key, dim, slices):
    """Deterministic Glorot-ish init for the two bias-free Linear layers (stored transposed)."""
    hidden = dim // slices
    k1, k2 = jax.random.split(key, 2)

    def glorot(k, shape):
        fan_in, fan_out = shape
        lim = (6.0 / (fan_in + fan_out)) ** 0.5
        return jax.random.uniform(k, shape, jnp.float32, -lim, lim)

    w1 = glorot(k1, (dim, hidden))   # mlp[0].weight^T
    w2 = glorot(k2, (hidden, dim))   # mlp[2].weight^T
    return w1, w2


if __name__ == "__main__":
    key = jax.random.PRNGKey(0)
    k_x, k_p = jax.random.split(key, 2)

    # Small, lane-aligned demo shapes: 512 rows, dim=256, slices=4 -> hidden=64
    # (zero-padded to 128 inside the wrapper). tile_n=256 here so the test
    # exercises a multi-tile grid; production default is tile_n>=1024.
    num_rows, dim, slices = 512, 256, 4
    x = jax.random.normal(k_x, (num_rows, dim), jnp.float32)
    w1, w2 = init_params(k_p, dim, slices)

    out = feature_booster_forward(x, w1, w2, tile_n=256)
    out = jax.block_until_ready(out)

    # Pure-JAX reference of the original module's forward (unpadded weights).
    h_ref = jnp.maximum(x @ w1, 0.0)
    mlp_ref = h_ref @ w2
    ref = x * jax.nn.sigmoid(mlp_ref + mlp_ref)

    assert out.shape == (num_rows, dim)
    assert bool(jnp.all(jnp.isfinite(out)))
    assert bool(jnp.allclose(out, ref, rtol=1e-5, atol=1e-5))
    print("KERNEL_OK")
</pallas_src>

<mosaic_0001>
module attributes {stable_mosaic.version = 11 : i64} {
  func.func @feature_booster_kernel(%arg0: i32, %arg1: memref<256x256xf32, #tpu.memory_space<vmem>>, %arg2: memref<256x128xf32, #tpu.memory_space<vmem>>, %arg3: memref<128x256xf32, #tpu.memory_space<vmem>>, %arg4: memref<256x256xf32, #tpu.memory_space<vmem>>) attributes {dimension_semantics = [#tpu.dimension_semantics<parallel>], iteration_bounds = array<i64: 2>, scalar_prefetch = 0 : i64, scratch_operands = 0 : i64, tpu.core_type = #tpu.core_type<tc>, window_params = [{transform_indices = @transform_0, window_bounds = array<i64: 256, 256>}, {pipeline_mode = #tpu.pipeline_mode<synchronous>, transform_indices = @transform_1, window_bounds = array<i64: 256, 128>}, {pipeline_mode = #tpu.pipeline_mode<synchronous>, transform_indices = @transform_2, window_bounds = array<i64: 128, 256>}, {transform_indices = @transform_3, window_bounds = array<i64: 256, 256>}]} {
    %c0 = arith.constant 0 : index
    %c0_0 = arith.constant 0 : index
    %0 = vector.load %arg1[%c0, %c0_0] : memref<256x256xf32, #tpu.memory_space<vmem>>, vector<256x256xf32>
    %c0_1 = arith.constant 0 : index
    %c0_2 = arith.constant 0 : index
    %1 = vector.load %arg2[%c0_1, %c0_2] : memref<256x128xf32, #tpu.memory_space<vmem>>, vector<256x128xf32>
    %cst = arith.constant dense<0.000000e+00> : vector<256x128xf32>
    %2 = tpu.matmul %0, %1, %cst {dimension_numbers = #tpu.dot_dimension_numbers<[1], [0], [0], [1], [0, 0, 1, 1], [], []>} : vector<256x256xf32>, vector<256x128xf32>, vector<256x128xf32> -> vector<256x128xf32>
    %cst_3 = arith.constant 0.000000e+00 : f32
    %3 = vector.broadcast %cst_3 : f32 to vector<256x128xf32>
    %4 = arith.maximumf %2, %3 : vector<256x128xf32>
    %c0_4 = arith.constant 0 : index
    %c0_5 = arith.constant 0 : index
    %5 = vector.load %arg3[%c0_4, %c0_5] : memref<128x256xf32, #tpu.memory_space<vmem>>, vector<128x256xf32>
    %cst_6 = arith.constant dense<0.000000e+00> : vector<256x256xf32>
    %6 = tpu.matmul %4, %5, %cst_6 {dimension_numbers = #tpu.dot_dimension_numbers<[1], [0], [0], [1], [0, 0, 1, 1], [], []>} : vector<256x128xf32>, vector<128x256xf32>, vector<256x256xf32> -> vector<256x256xf32>
    %7 = arith.addf %6, %6 : vector<256x256xf32>
    %8 = arith.negf %7 : vector<256x256xf32>
    %9 = math.exp %8 : vector<256x256xf32>
    %cst_7 = arith.constant 1.000000e+00 : f32
    %10 = vector.broadcast %cst_7 : f32 to vector<256x256xf32>
    %11 = arith.addf %10, %9 : vector<256x256xf32>
    %12 = arith.divf %10, %11 : vector<256x256xf32>
    %13 = arith.mulf %0, %12 : vector<256x256xf32>
    %c0_8 = arith.constant 0 : index
    %c0_9 = arith.constant 0 : index
    %14 = vector.load %arg4[%c0_8, %c0_9] : memref<256x256xf32, #tpu.memory_space<vmem>>, vector<256x256xf32>
    tpu.vector_store %arg4[%c0_8, %c0_9], %13 {strides = array<i32>} : memref<256x256xf32, #tpu.memory_space<vmem>>, vector<256x256xf32>,
    return
  }
  func.func @transform_0(%arg0: i32) -> (i32, i32) {
    %c0_i32 = arith.constant 0 : i32
    %c0_i32_0 = arith.constant 0 : i32
    return %arg0, %c0_i32 : i32, i32
  }
  func.func @transform_1(%arg0: i32) -> (i32, i32) {
    %c0_i32 = arith.constant 0 : i32
    %c0_i32_0 = arith.constant 0 : i32
    %c0_i32_1 = arith.constant 0 : i32
    return %c0_i32, %c0_i32_0 : i32, i32
  }
  func.func @transform_2(%arg0: i32) -> (i32, i32) {
    %c0_i32 = arith.constant 0 : i32
    %c0_i32_0 = arith.constant 0 : i32
    %c0_i32_1 = arith.constant 0 : i32
    return %c0_i32, %c0_i32_0 : i32, i32
  }
  func.func @transform_3(%arg0: i32) -> (i32, i32) {
    %c0_i32 = arith.constant 0 : i32
    %c0_i32_0 = arith.constant 0 : i32
    return %arg0, %c0_i32 : i32, i32
  }
}

</mosaic_0001>

<bundles_post_ra>
// kernel: tpu_custom_call.1
= control target key start
LH: loop header
LB: loop body
LE: loop exit
PB: predicated region body
PF: predicated region fallthrough
CT: control target
= control target key end

     0   :  { %8 = vsyncpa [#allocation3], 0  ;;  %s2824_s0 = inlined_call_operand.hbm [shape: f32[512,256], index: 0, kind: input, shape index: {}]   ;;  %s2825_s1 = inlined_call_operand.hbm [shape: f32[256,128], index: 1, kind: input, shape index: {}]   ;;  %s2826_s2 = inlined_call_operand.hbm [shape: f32[128,256], index: 2, kind: input, shape index: {}]   ;;  %s2827_s3 = inlined_call_operand.hbm [shape: f32[512,256], index: 3, kind: output, shape index: {}]  }
   0x1   :  { %10 = vsyncpa [#allocation3 + $0x1], 0 }
   0x2   :  { %11 = vsyncpa [#allocation6], 0 }
   0x3   :  { %12 = vsyncpa [#allocation4], 0 }
   0x4   :  { %14 = vsyncpa [#allocation4 + $0x1], 0  ;;  %s2281_s12 = smov 0   ;;  %s2283_s13 = smov 0  }
   0x5   :  { %s2285_s14 = smov 0   ;;  %s2287_s15 = smov 0  }
   0x6 LB: > { %s2302_s16 = sadd.s32 4294967295, %s2247_s15   ;;  %s1546_s17 = sadd.s32 4294967294, %s2247_s15   ;;  %s2247_s15 = sphi %s2287_s15, %s2847_s15   ;;  %s2243_s14 = sphi %s2285_s14, %s2846_s14   ;;  %s2239_s13 = sphi %s2283_s13, %s2845_s13   ;;  %s2235_s12 = sphi %s2281_s12, %s2844_s12  }
   0x7   : > { %p40_p0 = scmp.ne.s32.totalorder %s2239_s13, %s2235_s12  ;;  %p2828_p1 = scmp.eq.s32.totalorder %s2302_s16, 0 }
   0x8   : > { %p112_p3 = scmp.eq.s32.totalorder %s1546_s17, 1  ;;  %p1547_p5 = scmp.ge.s32.totalorder %s2247_s15, 1 }
   0x9   : > { %p2311_p4 = por %p2828_p1, %p40_p0  ;;  %p119_p7 = scmp.lt.s32.totalorder %s2247_s15, 3 }
   0xa   : > { %p2316_p6 = por %p112_p3, %p40_p0  ;;  %s2249_s21 = smov [#allocation5]  }
   0xb   : > { %s2831_s18 = scalar_select %p2311_p4, 1, 0 }
   0xc   : > { %s2832_s19 = scalar_select %p2316_p6, 1, 0 }
   0xd   : > { %p2321_p8 = pnand %p1547_p5, %p119_p7  ;;  %s131_s22 = sshll.u32 %s2249_s21, 4  ;;  %s2325_s22 = int_to_ptr.vmem [resolvable:$true] %s131_s22 }
   0xe   : > { %s2250_s24 = smov [#allocation7]   ;;  %s2091_s28 = scalar_lea.hbm %s2825_s1, 4096 }
   0xf   : > { %p1726_p9 = pneg %p2321_p8  ;;  %s144_s25 = sshll.u32 %s2250_s24, 4  ;;  %s2336_s25 = int_to_ptr.vmem [resolvable:$true] %s144_s25 }
  0x10   : > { %p2092_p12 = scmp.ne.s32.totalorder %s2825_s1, %s2091_s28  ;;  %p2098_p5 = scmp.lt.u32.totalorder %s2091_s28, %s2825_s1 }
  0x11   : > { %p2332_p11 = pnand %p1726_p9, %p2828_p1 }
  0x13   : > { %p2093_p13 = pneg %p2332_p11 }
  0x15   : > { %p2094_p0 = pnand %p2093_p13, %p2092_p12 }
  0x17   : > { %p2095_p3 = pneg %p2094_p0 }
  0x19   : > { %p2100_p7 = pnand %p2098_p5, %p2095_p3 }
  0x1b   : > { %2103 = shalt.err (!%p2100_p7)
}
  0x1c   : > { %s2104_s6 = scalar_lea.vmem %s2325_s22, 4096  ;;  %p2112_p2 = scmp.lt.s32.totalorder %s2325_s22, %s2325_s22 }
  0x1d   : > { %p2105_p9 = scmp.ne.s32.totalorder %s2325_s22, %s2104_s6  ;;  %p2113_p12 = scmp.lt.s32.totalorder %s2104_s6, %s2104_s6 }
  0x1f   : > { %p2107_p10 = pnand %p2105_p9, %p2093_p13  ;;  %p2114_p0 = por %p2113_p12, %p2112_p2 }
  0x21   : > { %p2108_p1 = pneg %p2107_p10 }
  0x23   : > { %p2115_p6 = pnand %p2114_p0, %p2108_p1 }
  0x25   : > { %2118 = shalt.err (!%p2115_p6)
}
  0x26   : > { %s2251_s7 = smov 128   ;;  %s2252_s8 = smov 8  }
  0x27   : > { %1729 = dma.hbm_to_vmem [thread:$0]  (!%p2332_p11), %s2825_s1, 4096, %s2325_s22, [#allocation6], %s2251_s7, %s2251_s7, %s2252_s8  }
  0x28   : > { %s2119_s21 = scalar_lea.hbm %s2826_s2, 4096 }
  0x29   : > { %p2120_p2 = scmp.ne.s32.totalorder %s2826_s2, %s2119_s21  ;;  %p2126_p10 = scmp.lt.u32.totalorder %s2119_s21, %s2826_s2 }
  0x2b   : > { %p2122_p1 = pnand %p2120_p2, %p2093_p13 }
  0x2d   : > { %p2123_p6 = pneg %p2122_p1 }
  0x2f   : > { %p2128_p3 = pnand %p2126_p10, %p2123_p6 }
  0x31   : > { %2131 = shalt.err (!%p2128_p3)
}
  0x32   : > { %s2132_s22 = scalar_lea.vmem %s2336_s25, 4096  ;;  %p2140_p12 = scmp.lt.s32.totalorder %s2336_s25, %s2336_s25 }
  0x33   : > { %p2133_p5 = scmp.ne.s32.totalorder %s2336_s25, %s2132_s22  ;;  %p2141_p0 = scmp.lt.s32.totalorder %s2132_s22, %s2132_s22 }
  0x35   : > { %p2135_p7 = pnand %p2133_p5, %p2093_p13  ;;  %p2142_p2 = por %p2141_p0, %p2140_p12 }
  0x37   : > { %p2136_p9 = pneg %p2135_p7 }
  0x39   : > { %p2143_p1 = pnand %p2142_p2, %p2136_p9 }
  0x3b   : > { %2146 = shalt.err (!%p2143_p1)
}
  0x3c   : > { %s2253_s29 = smov 256   ;;  %s2254_s30 = smov 16  }
  0x3d   : > { %1732 = dma.hbm_to_vmem [thread:$0]  (!%p2332_p11), %s2826_s2, 4096, %s2336_s25, [#allocation6], %s2253_s29, %s2253_s29, %s2254_s30  }
  0x3e   : > { %s2394_s6 = sadd.s32 1, %s2247_s15   ;;  %s27_s8 = sadd.s32 1, %s2243_s14 }
  0x3f   : > { %s24_s7 = ssub.s32 %s2247_s15, %s2394_s6  ;;  %p34_p6 = scmp.ne.s32.totalorder %s2243_s14, %s2239_s13 }
  0x40   : > { %p25_p13 = scmp.eq.s32.totalorder %s24_s7, 0  ;;  %p35_p10 = scmp.eq.s32.totalorder %s2247_s15, 0 }
  0x41   : > { %p2835_p5 = scmp.eq.s32.totalorder %s2302_s16, 1  ;;  %p1743_p9 = scmp.lt.s32.totalorder %s2247_s15, 2 }
  0x42   : > { %s2403_s9 = scalar_select %p25_p13, %s2243_s14, %s27_s8  }
  0x43   : > { %p36_p3 = por %p35_p10, %p34_p6  ;;  %p2407_p7 = por %p2835_p5, %p34_p6 }
  0x44   : > { %s158_s10 = sand.u32 1, %s2243_s14   ;;  %s1631_s25 = sshll.u32 %s2247_s15, 13 }
  0x45   : > { %s2836_s23 = scalar_select %p2407_p7, 1, 0 }
  0x46   : > { %s1551_s11 = sshll.u32 %s158_s10, 9  ;;  %s2417_s24 = scalar_lea.hbm %s2824_s0, %s1631_s25 }
  0x47   : > { %s162_s26 = scalar_lea.vmem [#allocation2], %s1551_s11  ;;  %p2421_p11 = pnand %p1743_p9, %p36_p3 }
  0x48   : > { %s170_s27 = sshll.u32 %s162_s26, 4  ;;  %s2425_s22 = scalar_lea.sflag [#allocation3], %s158_s10  ;;  %s2419_s27 = int_to_ptr.vmem [resolvable:$true] %s170_s27 }
  0x49   : > { %s2147_s4 = scalar_lea.hbm %s2417_s24, 8192  ;;  %p2149_p0 = pneg %p2421_p11 }
  0x4a   : > { %p2148_p12 = scmp.ne.s32.totalorder %s2417_s24, %s2147_s4  ;;  %s2152_s8 = scalar_lea.hbm %s2824_s0, 16384 }
  0x4b   : > { %p2153_p13 = scmp.lt.u32.totalorder %s2417_s24, %s2824_s0  ;;  %p2154_p6 = scmp.lt.u32.totalorder %s2152_s8, %s2147_s4 }
  0x4c   : > { %p2150_p2 = pnand %p2149_p0, %p2148_p12  ;;  %p2156_p3 = scmp.lt.u32.totalorder %s2147_s4, %s2417_s24 }
  0x4d   : > { %p2155_p10 = por %p2154_p6, %p2153_p13 }
  0x4e   : > { %p2151_p1 = pneg %p2150_p2 }
  0x4f   : > { %p2157_p5 = por %p2156_p3, %p2155_p10 }
  0x51   : > { %p2158_p9 = pnand %p2157_p5, %p2151_p1 }
  0x53   : > { %2161 = shalt.err (!%p2158_p9)
}
  0x54   : > { %s2162_s10 = scalar_lea.vmem %s2419_s27, 8192  ;;  %s2255_s17 = smov [#allocation2]  }
  0x55   : > { %p2163_p12 = scmp.ne.s32.totalorder %s2419_s27, %s2162_s10  ;;  %s2167_s21 = sshll.u32 %s2255_s17, 4  ;;  %s2168_s21 = int_to_ptr.vmem [resolvable:$false] %s2167_s21 }
  0x56   : > { %s2169_s26 = scalar_lea.vmem %s2168_s21, 16384  ;;  %p2170_p4 = scmp.lt.s32.totalorder %s2419_s27, %s2168_s21 }
  0x57   : > { %p2165_p2 = pnand %p2163_p12, %p2149_p0  ;;  %p2171_p13 = scmp.lt.s32.totalorder %s2169_s26, %s2162_s10 }
  0x59   : > { %p2166_p7 = pneg %p2165_p2  ;;  %p2172_p6 = por %p2171_p13, %p2170_p4 }
  0x5b   : > { %p2173_p10 = pnand %p2172_p6, %p2166_p7 }
  0x5d   : > { %2176 = shalt.err (!%p2173_p10)
}
  0x5e   : > { %1736 = dma.hbm_to_vmem [thread:$0]  (!%p2421_p11), %s2417_s24, 8192, %s2419_s27, %s2425_s22, %s2253_s29, %s2253_s29, %s2254_s30  }
  0x5f   : > { %182 = sbr.rel (%p2321_p8) target bundleno = 770 (0x302), region = 32  ;;  %s2459_s4 = sand.u32 (!%p2321_p8), 1, %s2239_s13  }
  0x60   : > { %s1556_s5 = sshll.u32 (!%p2321_p8), %s2459_s4, 9  ;;  %s185_s7 = scalar_lea.sflag (!%p2321_p8), [#allocation3], %s2459_s4 }
  0x61   : > { %s2465_s28 = scalar_lea.vmem (!%p2321_p8), [#allocation2], %s1556_s5  ;;  %p2838_p4 = scmp.ne.s32.totalorder (!%p2321_p8), %s2831_s18, 0 }
  0x66   : > { %2222 = dma.done.wait (%p2838_p4), %s185_s7, 8192  }
  0x67   : > { %2224 = vsyncadd (%p2838_p4), %s185_s7, 4294959104  ;;  %p2839_p7 = scmp.eq.s32.totalorder %s2302_s16, 0 }
  0x69   : > { %2226 = dma.done.wait (%p2839_p7), [#allocation6], 8192   ;;  %p2840_p8 = pmov %p2839_p7 }
  0x6a   : > { %v2256_v0 = vmov 0.0|0.0   ;;  %v285_v1 = vld [vmem:[#allocation5] sm:$0xff]  ;;  %v286_v2 = vld [vmem:[#allocation5 + $0x8] sm:$0xff]  ;;  %v287_v3 = vld [vmem:[#allocation5 + $0x10] sm:$0xff]  ;;  %s2645_s18 = scalar_lea.vmem [#allocation8], %s1556_s5  ;;  %s1633_s20 = sshll.u32 %s2302_s16, 13 }
  0x6b   : > { %2228 = vsyncadd (%p2840_p8), [#allocation6], 4294959104  ;;  %1634 = vmatprep.subr.bf16.mxu0 %v2256_v0  ;;  %v1635_v4 = vpack.c.bf16 %v286_v2, %v285_v1  ;;  %v288_v5 = vld [vmem:[#allocation5 + $0x18] sm:$0xff]  ;;  %v289_v7 = vld [vmem:[#allocation5 + $0x20] sm:$0xff]  ;;  %s1454_s29 = sshll.u32 %s2645_s18, 4  ;;  %s2776_s27 = scalar_lea.hbm %s2827_s3, %s1633_s20  ;;  %s2778_s29 = int_to_ptr.vmem [resolvable:$true] %s1454_s29 }
  0x6c   : > { %v1638_v6 = vpack.c.bf16 %v288_v5, %v287_v3  ;;  %v290_v8 = vld [vmem:[#allocation5 + $0x28] sm:$0xff]  ;;  %v291_v10 = vld [vmem:[#allocation5 + $0x30] sm:$0xff]  ;;  %v292_v11 = vld [vmem:[#allocation5 + $0x38] sm:$0xff]  ;;  %s1440_s16 = scalar_lea.sflag [#allocation4], %s2459_s4  ;;  %s2177_s22 = scalar_lea.vmem %s2778_s29, 8192 }
  0x6d   : > { %1636 = vmatpush1.bf16.msra.mxu0 %v1635_v4  ;;  %v1641_v9 = vpack.c.bf16 %v290_v8, %v289_v7  ;;  %v2479_v12 = vld [vmem:[%s2465_s28 + $0x8] sm:$0xff]  ;;  %v1644_v13 = vpack.c.bf16 %v292_v11, %v291_v10  ;;  %v293_v14 = vld [vmem:[#allocation5 + $0x40] sm:$0xff]  ;;  %v295_v17 = vld [vmem:[#allocation5 + $0x50] sm:$0xff]  ;;  %p2178_p11 = scmp.ne.s32.totalorder %s2778_s29, %s2177_s22  ;;  %p2841_p0 = scmp.ne.s32.totalorder %s2836_s23, 0 }
  0x6e   : > { %1637 = vmatprep.subr.bf16.mxu0 %v2256_v0  ;;  %381 = vmatprep.mubr.f32.mxu0 %v2479_v12  ;;  %v294_v15 = vld [vmem:[#allocation5 + $0x48] sm:$0xff]  ;;  %v296_v18 = vld [vmem:[#allocation5 + $0x58] sm:$0xff]  ;;  %v297_v20 = vld [vmem:[#allocation5 + $0x60] sm:$0xff]  ;;  %s2258_s8 = smov [#allocation8]  }
  0x6f   : > { %v1647_v16 = vpack.c.bf16 %v294_v15, %v293_v14  ;;  %v1650_v19 = vpack.c.bf16 %v296_v18, %v295_v17  ;;  %v298_v21 = vld [vmem:[#allocation5 + $0x68] sm:$0xff]  ;;  %v299_v23 = vld [vmem:[#allocation5 + $0x70] sm:$0xff]  ;;  %v300_v24 = vld [vmem:[#allocation5 + $0x78] sm:$0xff]  ;;  %p2179_p1 = pnand %p2178_p11, %p2841_p0  ;;  %s2181_s11 = sshll.u32 %s2258_s8, 4  ;;  %s2182_s11 = int_to_ptr.vmem [resolvable:$false] %s2181_s11 }
  0x70   : > { %v1653_v22 = vpack.c.bf16 %v298_v21, %v297_v20  ;;  %v1656_v25 = vpack.c.bf16 %v300_v24, %v299_v23  ;;  %v301_v26 = vld [vmem:[#allocation5 + $0x80] sm:$0xff]  ;;  %v302_v27 = vld [vmem:[#allocation5 + $0x88] sm:$0xff]  ;;  %v303_v29 = vld [vmem:[#allocation5 + $0x90] sm:$0xff]  ;;  %s2183_s25 = scalar_lea.vmem %s2182_s11, 16384  ;;  %p2184_p5 = scmp.lt.s32.totalorder %s2778_s29, %s2182_s11 }
  0x71   : > { %1639 = vmatpush1.bf16.msra.mxu0 %v1638_v6  ;;  %v1659_v28 = vpack.c.bf16 %v302_v27, %v301_v26  ;;  %v304_v30 = vld [vmem:[#allocation5 + $0x98] sm:$0xff]  ;;  %v305_v32 = vld [vmem:[#allocation5 + $0xa0] sm:$0xff]  ;;  %v306_v33 = vld [vmem:[#allocation5 + $0xa8] sm:$0xff]  ;;  %p2180_p3 = pneg %p2179_p1  ;;  %p2185_p9 = scmp.lt.s32.totalorder %s2183_s25, %s2177_s22 }
  0x72   : > { %1640 = vmatprep.subr.bf16.mxu0 %v2256_v0  ;;  %v1662_v31 = vpack.c.bf16 %v304_v30, %v303_v29  ;;  %v1665_v34 = vpack.c.bf16 %v306_v33, %v305_v32  ;;  %v307_v35 = vld [vmem:[#allocation5 + $0xb0] sm:$0xff]  ;;  %v308_v36 = vld [vmem:[#allocation5 + $0xb8] sm:$0xff]  ;;  %v309_v38 = vld [vmem:[#allocation5 + $0xc0] sm:$0xff] }
  0x73   : > { %v1668_v37 = vpack.c.bf16 %v308_v36, %v307_v35  ;;  %v310_v39 = vld [vmem:[#allocation5 + $0xc8] sm:$0xff]  ;;  %v311_v41 = vld [vmem:[#allocation5 + $0xd0] sm:$0xff]  ;;  %v312_v42 = vld [vmem:[#allocation5 + $0xd8] sm:$0xff]  ;;  %p2186_p12 = por %p2185_p9, %p2184_p5 }
  0x74   : > { %v1671_v40 = vpack.c.bf16 %v310_v39, %v309_v38  ;;  %v1674_v43 = vpack.c.bf16 %v312_v42, %v311_v41  ;;  %v313_v44 = vld [vmem:[#allocation5 + $0xe0] sm:$0xff]  ;;  %v314_v45 = vld [vmem:[#allocation5 + $0xe8] sm:$0xff]  ;;  %v315_v47 = vld [vmem:[#allocation5 + $0xf0] sm:$0xff] }
  0x75   : > { %1642 = vmatpush1.bf16.msra.mxu0 %v1641_v9  ;;  %v1677_v46 = vpack.c.bf16 %v314_v45, %v313_v44  ;;  %v316_v48 = vld [vmem:[#allocation5 + $0xf8] sm:$0xff]  ;;  %v2496_v50 = vld [vmem:[%s2465_s28] sm:$0xff]  ;;  %v575_v52 = vld [vmem:[#allocation7 + $0x8] sm:$0xff]  ;;  %p2187_p2 = pnand %p2186_p12, %p2180_p3 }
  0x76   : > { %1643 = vmatprep.subr.bf16.mxu0 %v2256_v0  ;;  %v1680_v49 = vpack.c.bf16 %v316_v48, %v315_v47  ;;  %v2499_v51 = vld [vmem:[%s2465_s28 + $0x18] sm:$0xff]  ;;  %v574_v54 = vld [vmem:[#allocation7] sm:$0xff]  ;;  %v576_v56 = vld [vmem:[#allocation7 + $0x10] sm:$0xff] }
  0x77   : > { %v577_v53 = vld [vmem:[#allocation7 + $0x18] sm:$0xff]  ;;  %v579_v57 = vld [vmem:[#allocation7 + $0x28] sm:$0xff]  ;;  %v1684_v59 = vpack.c.bf16 %v576_v56, %v574_v54  ;;  %v578_v61 = vld [vmem:[#allocation7 + $0x20] sm:$0xff] }
  0x78   : > { %v1682_v55 = vpack.c.bf16 %v577_v53, %v575_v52  ;;  %v581_v58 = vld [vmem:[#allocation7 + $0x38] sm:$0xff]  ;;  %v580_v62 = vld [vmem:[#allocation7 + $0x30] sm:$0xff]  ;;  %v583_v63 = vld [vmem:[#allocation7 + $0x48] sm:$0xff] }
  0x79   : > { %1645 = vmatpush1.bf16.msra.mxu0 %v1644_v13  ;;  %v1686_v60 = vpack.c.bf16 %v581_v58, %v579_v57  ;;  %v1688_v1 = vpack.c.bf16 %v580_v62, %v578_v61  ;;  %v2504_v2 = vld [vmem:[%s2465_s28 + $0x10] sm:$0xff]  ;;  %v582_v4 = vld [vmem:[#allocation7 + $0x40] sm:$0xff]  ;;  %v2507_v6 = vld [vmem:[%s2465_s28 + $0x28] sm:$0xff] }
  0x7a   : > { %1646 = vmatprep.subr.bf16.mxu0 %v2256_v0  ;;  %1683 = vmatprep.subr.bf16.mxu1 %v1682_v55  ;;  %v584_v5 = vld [vmem:[#allocation7 + $0x50] sm:$0xff]  ;;  %v587_v7 = vld [vmem:[#allocation7 + $0x68] sm:$0xff]  ;;  %v589_v8 = vld [vmem:[#allocation7 + $0x78] sm:$0xff] }
  0x7b   : > { %1685 = vmatpush1.bf16.msra.mxu1 %v1684_v59  ;;  %v1692_v9 = vpack.c.bf16 %v584_v5, %v582_v4  ;;  %v2512_v10 = vld [vmem:[%s2465_s28 + $0x20] sm:$0xff]  ;;  %v1694_v11 = vpack.c.bf16 %v589_v8, %v587_v7  ;;  %v588_v14 = vld [vmem:[#allocation7 + $0x70] sm:$0xff]  ;;  %v2515_v15 = vld [vmem:[%s2465_s28 + $0x38] sm:$0xff] }
  0x7c   : > { %1687 = vmatprep.subr.bf16.mxu1 %v1686_v60  ;;  %v586_v13 = vld [vmem:[#allocation7 + $0x60] sm:$0xff]  ;;  %v593_v17 = vld [vmem:[#allocation7 + $0x98] sm:$0xff]  ;;  %v2523_v23 = vld [vmem:[%s2465_s28 + $0x48] sm:$0xff] }
  0x7d   : > { %1648 = vmatpush1.bf16.msra.mxu0 %v1647_v16  ;;  %v591_v16 = vld [vmem:[#allocation7 + $0x88] sm:$0xff]  ;;  %v1696_v18 = vpack.c.bf16 %v588_v14, %v586_v13  ;;  %v590_v21 = vld [vmem:[#allocation7 + $0x80] sm:$0xff]  ;;  %v596_v30 = vld [vmem:[#allocation7 + $0xb0] sm:$0xff] }
  0x7e   : > { %1649 = vmatprep.subr.bf16.mxu0 %v2256_v0  ;;  %v1698_v20 = vpack.c.bf16 %v593_v17, %v591_v16  ;;  %v595_v24 = vld [vmem:[#allocation7 + $0xa8] sm:$0xff]  ;;  %v2528_v27 = vld [vmem:[%s2465_s28 + $0x40] sm:$0xff]  ;;  %v601_v33 = vld [vmem:[#allocation7 + $0xd8] sm:$0xff] }
  0x7f   : > { %1689 = vmatpush1.bf16.msra.mxu1 %v1688_v1  ;;  %v594_v29 = vld [vmem:[#allocation7 + $0xa0] sm:$0xff]  ;;  %v599_v32 = vld [vmem:[#allocation7 + $0xc8] sm:$0xff]  ;;  %v2536_v35 = vld [vmem:[%s2465_s28 + $0x50] sm:$0xff] }
  0x80   : > { %v1706_v36 = vpack.c.bf16 %v601_v33, %v599_v32  ;;  %v600_v38 = vld [vmem:[#allocation7 + $0xd0] sm:$0xff]  ;;  %v2539_v39 = vld [vmem:[%s2465_s28 + $0x68] sm:$0xff]  ;;  %v605_v41 = vld [vmem:[#allocation7 + $0xf8] sm:$0xff] }
  0x81   : > { %1651 = vmatpush1.bf16.msra.mxu0 %v1650_v19  ;;  %v2520_v19 = vld [vmem:[%s2465_s28 + $0x30] sm:$0xff]  ;;  %v2547_v45 = vld [vmem:[%s2465_s28 + $0x78] sm:$0xff]  ;;  %v2555_v47 = vld [vmem:[%s2465_s28 + $0x88] sm:$0xff] }
  0x82   : > { %1652 = vmatprep.subr.bf16.mxu0 %v2256_v0  ;;  %v2560_v48 = vld [vmem:[%s2465_s28 + $0x80] sm:$0xff]  ;;  %v239_v52 = vld [vmem:[%s2465_s28 + $0x90] sm:$0xff]  ;;  %v242_v53 = vld [vmem:[%s2465_s28 + $0xa8] sm:$0xff] }
  0x83   : > { %v241_v54 = vld [vmem:[%s2465_s28 + $0xa0] sm:$0xff]  ;;  %v244_v55 = vld [vmem:[%s2465_s28 + $0xb8] sm:$0xff]  ;;  %v243_v56 = vld [vmem:[%s2465_s28 + $0xb0] sm:$0xff] }
  0x84   : > { %v246_v57 = vld [vmem:[%s2465_s28 + $0xc8] sm:$0xff]  ;;  %v245_v58 = vld [vmem:[%s2465_s28 + $0xc0] sm:$0xff]  ;;  %v248_v59 = vld [vmem:[%s2465_s28 + $0xd8] sm:$0xff] }
  0x85   : > { %1654 = vmatpush1.bf16.msra.mxu0 %v1653_v22  ;;  %v592_v22 = vld [vmem:[#allocation7 + $0x90] sm:$0xff]  ;;  %v250_v61 = vld [vmem:[%s2465_s28 + $0xe8] sm:$0xff]  ;;  %v249_v62 = vld [vmem:[%s2465_s28 + $0xe0] sm:$0xff] }
  0x86   : > { %1655 = vmatprep.subr.bf16.mxu0 %v2256_v0  ;;  %v1700_v26 = vpack.c.bf16 %v592_v22, %v590_v21  ;;  %v247_v60 = vld [vmem:[%s2465_s28 + $0xd0] sm:$0xff]  ;;  %v254_v1 = vld [vmem:[%s2465_s28 + $0x108] sm:$0xff]  ;;  %v256_v4 = vld [vmem:[%s2465_s28 + $0x118] sm:$0xff] }
  0x87   : > { %v255_v5 = vld [vmem:[%s2465_s28 + $0x110] sm:$0xff]  ;;  %v258_v7 = vld [vmem:[%s2465_s28 + $0x128] sm:$0xff]  ;;  %v257_v8 = vld [vmem:[%s2465_s28 + $0x120] sm:$0xff] }
  0x88   : > { %v262_v13 = vld [vmem:[%s2465_s28 + $0x148] sm:$0xff]  ;;  %v261_v14 = vld [vmem:[%s2465_s28 + $0x140] sm:$0xff]  ;;  %v264_v16 = vld [vmem:[%s2465_s28 + $0x158] sm:$0xff] }
  0x89   : > { %1657 = vmatpush1.bf16.msra.mxu0 %v1656_v25  ;;  %v597_v25 = vld [vmem:[#allocation7 + $0xb8] sm:$0xff]  ;;  %v602_v17 = vld [vmem:[#allocation7 + $0xe0] sm:$0xff]  ;;  %v266_v22 = vld [vmem:[%s2465_s28 + $0x168] sm:$0xff] }
  0x8a   : > { %1658 = vmatprep.subr.bf16.mxu0 %v2256_v0  ;;  %v272_v32 = vld [vmem:[%s2465_s28 + $0x198] sm:$0xff]  ;;  %v271_v33 = vld [vmem:[%s2465_s28 + $0x190] sm:$0xff] }
  0x8d   : > { %1660 = vmatpush1.bf16.msra.mxu0 %v1659_v28  ;;  %v1702_v28 = vpack.c.bf16 %v597_v25, %v595_v24  ;;  %v265_v24 = vld [vmem:[%s2465_s28 + $0x160] sm:$0xff]  ;;  %v2257_v25 = vmov 0.0  }
  0x8e   : > { %1661 = vmatprep.subr.bf16.mxu0 %v2256_v0  ;;  %670 = vmatprep.mubr.f32.mxu1 %v2257_v25 }
  0x91   : > { %1663 = vmatpush1.bf16.msra.mxu0 %v1662_v31  ;;  %v2531_v31 = vld [vmem:[%s2465_s28 + $0x58] sm:$0xff] }
  0x92   : > { %1664 = vmatprep.subr.bf16.mxu0 %v2256_v0 }
  0x95   : > { %1666 = vmatpush1.bf16.msra.mxu0 %v1665_v34  ;;  %v1704_v34 = vpack.c.bf16 %v596_v30, %v594_v29  ;;  %v270_v29 = vld [vmem:[%s2465_s28 + $0x188] sm:$0xff]  ;;  %v269_v30 = vld [vmem:[%s2465_s28 + $0x180] sm:$0xff] }
  0x96   : > { %1667 = vmatprep.subr.bf16.mxu0 %v2256_v0 }
  0x99   : > { %1669 = vmatpush1.bf16.msra.mxu0 %v1668_v37  ;;  %v598_v37 = vld [vmem:[#allocation7 + $0xc0] sm:$0xff] }
  0x9a   : > { %1670 = vmatprep.subr.bf16.mxu0 %v2256_v0  ;;  %v1708_v42 = vpack.c.bf16 %v600_v38, %v598_v37  ;;  %v276_v37 = vld [vmem:[%s2465_s28 + $0x1b8] sm:$0xff]  ;;  %v275_v38 = vld [vmem:[%s2465_s28 + $0x1b0] sm:$0xff] }
  0x9d   : > { %1672 = vmatpush1.bf16.msra.mxu0 %v1671_v40  ;;  %v603_v40 = vld [vmem:[#allocation7 + $0xe8] sm:$0xff] }
  0x9e   : > { %1673 = vmatprep.subr.bf16.mxu0 %v2256_v0  ;;  %v1710_v44 = vpack.c.bf16 %v605_v41, %v603_v40  ;;  %v278_v40 = vld [vmem:[%s2465_s28 + $0x1c8] sm:$0xff]  ;;  %v277_v41 = vld [vmem:[%s2465_s28 + $0x1c0] sm:$0xff] }
  0xa1   : > { %1675 = vmatpush1.bf16.msra.mxu0 %v1674_v43  ;;  %v2544_v43 = vld [vmem:[%s2465_s28 + $0x60] sm:$0xff] }
  0xa2   : > { %1676 = vmatprep.subr.bf16.mxu0 %v2256_v0 }
  0xa5   : > { %1678 = vmatpush1.bf16.msra.mxu0 %v1677_v46  ;;  %v2552_v46 = vld [vmem:[%s2465_s28 + $0x70] sm:$0xff] }
  0xa6   : > { %1679 = vmatprep.subr.bf16.mxu0 %v2256_v0  ;;  %v585_v0 = vld [vmem:[#allocation7 + $0x58] sm:$0xff] }
  0xa7   : > { %v1690_v3 = vpack.c.bf16 %v585_v0, %v583_v63  ;;  %v252_v63 = vld [vmem:[%s2465_s28 + $0xf8] sm:$0xff]  ;;  %v251_v0 = vld [vmem:[%s2465_s28 + $0xf0] sm:$0xff] }
  0xa9   : > { %1681 = vmatpush1.bf16.msra.mxu0 %v1680_v49  ;;  %1691 = vmatprep.subr.bf16.mxu1 %v1690_v3  ;;  %v240_v49 = vld [vmem:[%s2465_s28 + $0x98] sm:$0xff]  ;;  %v253_v3 = vld [vmem:[%s2465_s28 + $0x100] sm:$0xff] }
  0xaa   : > { %1693 = vmatpush1.bf16.msra.mxu1 %v1692_v9  ;;  %v260_v9 = vld [vmem:[%s2465_s28 + $0x138] sm:$0xff] }
  0xab   : > { %1695 = vmatprep.subr.bf16.mxu1 %v1694_v11  ;;  %v259_v11 = vld [vmem:[%s2465_s28 + $0x130] sm:$0xff] }
  0xac   : > { %382 = vmatmul.mubr.f32.vlgmr.msra.gmra.mrb[0].mxu0 %v2496_v50 }
  0xad   : > { %386 = vmatprep.mubr.f32.mxu0 %v2499_v51 }
  0xae   : > { %1697 = vmatpush1.bf16.msra.mxu1 %v1696_v18  ;;  %v604_v18 = vld [vmem:[#allocation7 + $0xf0] sm:$0xff] }
  0xaf   : > { %1699 = vmatprep.subr.bf16.mxu1 %v1698_v20  ;;  %v263_v20 = vld [vmem:[%s2465_s28 + $0x150] sm:$0xff]  ;;  %v1712_v21 = vpack.c.bf16 %v604_v18, %v602_v17 }
  0xb0   : > { %387 = vmatmul.mubr.f32.gmra.mrb[2].mxu0 %v2504_v2 }
  0xb1   : > { %391 = vmatprep.mubr.f32.mxu0 %v2507_v6 }
  0xb2   : > { %1701 = vmatpush1.bf16.msra.mxu1 %v1700_v26  ;;  %v268_v26 = vld [vmem:[%s2465_s28 + $0x178] sm:$0xff] }
  0xb3   : > { %1703 = vmatprep.subr.bf16.mxu1 %v1702_v28  ;;  %v267_v28 = vld [vmem:[%s2465_s28 + $0x170] sm:$0xff] }
  0xb4   : > { %392 = vmatmul.mubr.f32.gmra.mrb[4].mxu0 %v2512_v10 }
  0xb5   : > { %396 = vmatprep.mubr.f32.mxu0 %v2515_v15 }
  0xb6   : > { %1705 = vmatpush1.bf16.msra.mxu1 %v1704_v34  ;;  %v274_v34 = vld [vmem:[%s2465_s28 + $0x1a8] sm:$0xff] }
  0xb7   : > { %1707 = vmatprep.subr.bf16.mxu1 %v1706_v36  ;;  %v273_v36 = vld [vmem:[%s2465_s28 + $0x1a0] sm:$0xff] }
  0xb8   : > { %397 = vmatmul.mubr.f32.gmra.mrb[6].mxu0 %v2520_v19 }
  0xb9   : > { %401 = vmatprep.mubr.f32.mxu0 %v2523_v23 }
  0xba   : > { %1709 = vmatpush1.bf16.msra.mxu1 %v1708_v42  ;;  %v280_v42 = vld [vmem:[%s2465_s28 + $0x1d8] sm:$0xff] }
  0xbb   : > { %1711 = vmatprep.subr.bf16.mxu1 %v1710_v44  ;;  %v279_v44 = vld [vmem:[%s2465_s28 + $0x1d0] sm:$0xff] }
  0xbc   : > { %402 = vmatmul.mubr.f32.gmra.mrb[8].mxu0 %v2528_v27 }
  0xbd   : > { %406 = vmatprep.mubr.f32.mxu0 %v2531_v31 }
  0xbe   : > { %1713 = vmatpush1.bf16.msra.mxu1 %v1712_v21 }
  0xc0   : > { %407 = vmatmul.mubr.f32.gmra.mrb[10].mxu0 %v2536_v35 }
  0xc1   : > { %411 = vmatprep.mubr.f32.mxu0 %v2539_v39 }
  0xc4   : > { %412 = vmatmul.mubr.f32.gmra.mrb[12].mxu0 %v2544_v43 }
  0xc5   : > { %416 = vmatprep.mubr.f32.mxu0 %v2547_v45 }
  0xc8   : > { %417 = vmatmul.mubr.f32.gmra.mrb[14].mxu0 %v2552_v46 }
  0xc9   : > { %421 = vmatprep.mubr.f32.mxu0 %v2555_v47 }
  0xcc   : > { %422 = vmatmul.mubr.f32.gmra.mrb[16].mxu0 %v2560_v48 }
  0xcd   : > { %426 = vmatprep.mubr.f32.mxu0 %v240_v49  ;;  %v282_v49 = vld [vmem:[%s2465_s28 + $0x1e8] sm:$0xff] }
  0xd0   : > { %427 = vmatmul.mubr.f32.gmra.mrb[18].mxu0 %v239_v52  ;;  %v281_v52 = vld [vmem:[%s2465_s28 + $0x1e0] sm:$0xff] }
  0xd1   : > { %431 = vmatprep.mubr.f32.mxu0 %v242_v53  ;;  %v284_v53 = vld [vmem:[%s2465_s28 + $0x1f8] sm:$0xff] }
  0xd4   : > { %432 = vmatmul.mubr.f32.gmra.mrb[20].mxu0 %v241_v54  ;;  %v283_v54 = vld [vmem:[%s2465_s28 + $0x1f0] sm:$0xff] }
  0xd5   : > { %436 = vmatprep.mubr.f32.mxu0 %v244_v55 }
  0xd8   : > { %437 = vmatmul.mubr.f32.gmra.mrb[22].mxu0 %v243_v56 }
  0xd9   : > { %441 = vmatprep.mubr.f32.mxu0 %v246_v57 }
  0xdc   : > { %442 = vmatmul.mubr.f32.gmra.mrb[24].mxu0 %v245_v58 }
  0xdd   : > { %446 = vmatprep.mubr.f32.mxu0 %v248_v59 }
  0xe0   : > { %447 = vmatmul.mubr.f32.gmra.mrb[26].mxu0 %v247_v60 }
  0xe1   : > { %451 = vmatprep.mubr.f32.mxu0 %v250_v61 }
  0xe4   : > { %452 = vmatmul.mubr.f32.gmra.mrb[28].mxu0 %v249_v62 }
  0xe5   : > { %456 = vmatprep.mubr.f32.mxu0 %v252_v63 }
  0xe8   : > { %457 = vmatmul.mubr.f32.gmra.mrb[30].mxu0 %v251_v0 }
  0xe9   : > { %461 = vmatprep.mubr.f32.mxu0 %v254_v1 }
  0xec   : > { %462 = vmatmul.mubr.f32.gmra.mrb[32].mxu0 %v253_v3 }
  0xed   : > { %466 = vmatprep.mubr.f32.mxu0 %v256_v4 }
  0xf0   : > { %467 = vmatmul.mubr.f32.gmra.mrb[34].mxu0 %v255_v5 }
  0xf1   : > { %471 = vmatprep.mubr.f32.mxu0 %v258_v7 }
  0xf4   : > { %472 = vmatmul.mubr.f32.gmra.mrb[36].mxu0 %v257_v8 }
  0xf5   : > { %476 = vmatprep.mubr.f32.mxu0 %v260_v9 }
  0xf8   : > { %477 = vmatmul.mubr.f32.gmra.mrb[38].mxu0 %v259_v11 }
  0xf9   : > { %481 = vmatprep.mubr.f32.mxu0 %v262_v13 }
  0xfc   : > { %482 = vmatmul.mubr.f32.gmra.mrb[40].mxu0 %v261_v14 }
  0xfd   : > { %486 = vmatprep.mubr.f32.mxu0 %v264_v16 }
 0x100   : > { %487 = vmatmul.mubr.f32.gmra.mrb[42].mxu0 %v263_v20 }
 0x101   : > { %491 = vmatprep.mubr.f32.mxu0 %v266_v22 }
 0x104   : > { %492 = vmatmul.mubr.f32.gmra.mrb[44].mxu0 %v265_v24 }
 0x105   : > { %496 = vmatprep.mubr.f32.mxu0 %v268_v26 }
 0x108   : > { %497 = vmatmul.mubr.f32.gmra.mrb[46].mxu0 %v267_v28 }
 0x109   : > { %501 = vmatprep.mubr.f32.mxu0 %v270_v29 }
 0x10c   : > { %502 = vmatmul.mubr.f32.gmra.mrb[48].mxu0 %v269_v30 }
 0x10d   : > { %506 = vmatprep.mubr.f32.mxu0 %v272_v32 }
 0x110   : > { %507 = vmatmul.mubr.f32.gmra.mrb[50].mxu0 %v271_v33 }
 0x111   : > { %511 = vmatprep.mubr.f32.mxu0 %v274_v34 }
 0x114   : > { %512 = vmatmul.mubr.f32.gmra.mrb[52].mxu0 %v273_v36 }
 0x115   : > { %516 = vmatprep.mubr.f32.mxu0 %v276_v37 }
 0x118   : > { %517 = vmatmul.mubr.f32.gmra.mrb[54].mxu0 %v275_v38 }
 0x119   : > { %521 = vmatprep.mubr.f32.mxu0 %v278_v40 }
 0x11c   : > { %522 = vmatmul.mubr.f32.gmra.mrb[56].mxu0 %v277_v41 }
 0x11d   : > { %526 = vmatprep.mubr.f32.mxu0 %v280_v42 }
 0x120   : > { %527 = vmatmul.mubr.f32.gmra.mrb[58].mxu0 %v279_v44 }
 0x121   : > { %531 = vmatprep.mubr.f32.mxu0 %v282_v49 }
 0x124   : > { %532 = vmatmul.mubr.f32.gmra.mrb[60].mxu0 %v281_v52 }
 0x125   : > { %536 = vmatprep.mubr.f32.mxu0 %v284_v53 }
 0x128   : > { %537 = vmatmul.mubr.f32.gmra.mrb[62].mxu0 %v283_v54 }
 0x17f   : > { %v383_v55 = vpop.f32.mrb[0].mxu0 }
 0x180   : > { %v542_v56 = vmax.f32 %v383_v55, 0.0  ;;  %v385_v57 = vpop.f32.mrb[1].mxu0 }
 0x182   : > { %671 = vmatmul.mubr.f32.vlgmr.msra.gmra.mrb[0].mxu1 %v542_v56 }
 0x183   : > { %v388_v58 = vpop.f32.mrb[2].mxu0  ;;  %676 = vmatprep.mubr.f32.mxu1 %v2257_v25 }
 0x184   : > { %v543_v59 = vmax.f32 %v388_v58, 0.0  ;;  %v390_v60 = vpop.f32.mrb[3].mxu0 }
 0x186   : > { %677 = vmatmul.mubr.f32.gmra.mrb[2].mxu1 %v543_v59 }
 0x187   : > { %v393_v61 = vpop.f32.mrb[4].mxu0  ;;  %682 = vmatprep.mubr.f32.mxu1 %v2257_v25 }
 0x188   : > { %v544_v62 = vmax.f32 %v393_v61, 0.0  ;;  %v395_v63 = vpop.f32.mrb[5].mxu0 }
 0x18a   : > { %683 = vmatmul.mubr.f32.gmra.mrb[4].mxu1 %v544_v62 }
 0x18b   : > { %v398_v0 = vpop.f32.mrb[6].mxu0  ;;  %688 = vmatprep.mubr.f32.mxu1 %v2257_v25 }
 0x18c   : > { %v545_v1 = vmax.f32 %v398_v0, 0.0  ;;  %v400_v3 = vpop.f32.mrb[7].mxu0 }
 0x18e   : > { %689 = vmatmul.mubr.f32.gmra.mrb[6].mxu1 %v545_v1 }
 0x18f   : > { %v403_v4 = vpop.f32.mrb[8].mxu0  ;;  %694 = vmatprep.mubr.f32.mxu1 %v2257_v25 }
 0x190   : > { %v546_v5 = vmax.f32 %v403_v4, 0.0  ;;  %v405_v7 = vpop.f32.mrb[9].mxu0 }
 0x192   : > { %695 = vmatmul.mubr.f32.gmra.mrb[8].mxu1 %v546_v5 }
 0x193   : > { %v408_v8 = vpop.f32.mrb[10].mxu0  ;;  %700 = vmatprep.mubr.f32.mxu1 %v2257_v25 }
 0x194   : > { %v547_v9 = vmax.f32 %v408_v8, 0.0  ;;  %v410_v11 = vpop.f32.mrb[11].mxu0 }
 0x196   : > { %701 = vmatmul.mubr.f32.gmra.mrb[10].mxu1 %v547_v9 }
 0x197   : > { %v413_v13 = vpop.f32.mrb[12].mxu0  ;;  %706 = vmatprep.mubr.f32.mxu1 %v2257_v25 }
 0x198   : > { %v548_v14 = vmax.f32 %v413_v13, 0.0  ;;  %v415_v16 = vpop.f32.mrb[13].mxu0 }
 0x19a   : > { %707 = vmatmul.mubr.f32.gmra.mrb[12].mxu1 %v548_v14 }
 0x19b   : > { %v418_v17 = vpop.f32.mrb[14].mxu0  ;;  %712 = vmatprep.mubr.f32.mxu1 %v2257_v25 }
 0x19c   : > { %v549_v18 = vmax.f32 %v418_v17, 0.0  ;;  %v420_v20 = vpop.f32.mrb[15].mxu0 }
 0x19e   : > { %713 = vmatmul.mubr.f32.gmra.mrb[14].mxu1 %v549_v18 }
 0x19f   : > { %v423_v21 = vpop.f32.mrb[16].mxu0  ;;  %718 = vmatprep.mubr.f32.mxu1 %v2257_v25 }
 0x1a0   : > { %v550_v22 = vmax.f32 %v423_v21, 0.0  ;;  %v425_v24 = vpop.f32.mrb[17].mxu0 }
 0x1a2   : > { %719 = vmatmul.mubr.f32.gmra.mrb[16].mxu1 %v550_v22 }
 0x1a3   : > { %v428_v26 = vpop.f32.mrb[18].mxu0  ;;  %724 = vmatprep.mubr.f32.mxu1 %v2257_v25 }
 0x1a4   : > { %v551_v28 = vmax.f32 %v428_v26, 0.0  ;;  %v430_v29 = vpop.f32.mrb[19].mxu0 }
 0x1a6   : > { %725 = vmatmul.mubr.f32.gmra.mrb[18].mxu1 %v551_v28 }
 0x1a7   : > { %v433_v30 = vpop.f32.mrb[20].mxu0  ;;  %730 = vmatprep.mubr.f32.mxu1 %v2257_v25 }
 0x1a8   : > { %v552_v32 = vmax.f32 %v433_v30, 0.0  ;;  %v435_v33 = vpop.f32.mrb[21].mxu0 }
 0x1aa   : > { %731 = vmatmul.mubr.f32.gmra.mrb[20].mxu1 %v552_v32 }
 0x1ab   : > { %v438_v34 = vpop.f32.mrb[22].mxu0  ;;  %736 = vmatprep.mubr.f32.mxu1 %v2257_v25 }
 0x1ac   : > { %v553_v36 = vmax.f32 %v438_v34, 0.0  ;;  %v440_v37 = vpop.f32.mrb[23].mxu0 }
 0x1ae   : > { %737 = vmatmul.mubr.f32.gmra.mrb[22].mxu1 %v553_v36 }
 0x1af   : > { %v443_v38 = vpop.f32.mrb[24].mxu0  ;;  %742 = vmatprep.mubr.f32.mxu1 %v2257_v25 }
 0x1b0   : > { %v554_v40 = vmax.f32 %v443_v38, 0.0  ;;  %v445_v41 = vpop.f32.mrb[25].mxu0 }
 0x1b2   : > { %743 = vmatmul.mubr.f32.gmra.mrb[24].mxu1 %v554_v40 }
 0x1b3   : > { %v448_v42 = vpop.f32.mrb[26].mxu0  ;;  %748 = vmatprep.mubr.f32.mxu1 %v2257_v25 }
 0x1b4   : > { %v555_v44 = vmax.f32 %v448_v42, 0.0  ;;  %v450_v49 = vpop.f32.mrb[27].mxu0 }
 0x1b6   : > { %749 = vmatmul.mubr.f32.gmra.mrb[26].mxu1 %v555_v44 }
 0x1b7   : > { %v453_v52 = vpop.f32.mrb[28].mxu0  ;;  %754 = vmatprep.mubr.f32.mxu1 %v2257_v25 }
 0x1b8   : > { %v556_v53 = vmax.f32 %v453_v52, 0.0  ;;  %v455_v54 = vpop.f32.mrb[29].mxu0 }
 0x1ba   : > { %755 = vmatmul.mubr.f32.gmra.mrb[28].mxu1 %v556_v53 }
 0x1bb   : > { %v458_v55 = vpop.f32.mrb[30].mxu0  ;;  %760 = vmatprep.mubr.f32.mxu1 %v2257_v25 }
 0x1bc   : > { %v557_v56 = vmax.f32 %v458_v55, 0.0  ;;  %v460_v57 = vpop.f32.mrb[31].mxu0 }
 0x1be   : > { %761 = vmatmul.mubr.f32.gmra.mrb[30].mxu1 %v557_v56 }
 0x1bf   : > { %v463_v58 = vpop.f32.mrb[32].mxu0  ;;  %766 = vmatprep.mubr.f32.mxu1 %v2257_v25 }
 0x1c0   : > { %v558_v59 = vmax.f32 %v463_v58, 0.0  ;;  %v465_v60 = vpop.f32.mrb[33].mxu0 }
 0x1c2   : > { %767 = vmatmul.mubr.f32.gmra.mrb[32].mxu1 %v558_v59 }
 0x1c3   : > { %v468_v61 = vpop.f32.mrb[34].mxu0  ;;  %772 = vmatprep.mubr.f32.mxu1 %v2257_v25 }
 0x1c4   : > { %v559_v62 = vmax.f32 %v468_v61, 0.0  ;;  %v470_v63 = vpop.f32.mrb[35].mxu0 }
 0x1c6   : > { %773 = vmatmul.mubr.f32.gmra.mrb[34].mxu1 %v559_v62 }
 0x1c7   : > { %v473_v0 = vpop.f32.mrb[36].mxu0  ;;  %778 = vmatprep.mubr.f32.mxu1 %v2257_v25 }
 0x1c8   : > { %v560_v1 = vmax.f32 %v473_v0, 0.0  ;;  %v475_v3 = vpop.f32.mrb[37].mxu0 }
 0x1ca   : > { %779 = vmatmul.mubr.f32.gmra.mrb[36].mxu1 %v560_v1 }
 0x1cb   : > { %v478_v4 = vpop.f32.mrb[38].mxu0  ;;  %784 = vmatprep.mubr.f32.mxu1 %v2257_v25 }
 0x1cc   : > { %v561_v5 = vmax.f32 %v478_v4, 0.0  ;;  %v480_v7 = vpop.f32.mrb[39].mxu0 }
 0x1ce   : > { %785 = vmatmul.mubr.f32.gmra.mrb[38].mxu1 %v561_v5 }
 0x1cf   : > { %v483_v8 = vpop.f32.mrb[40].mxu0  ;;  %790 = vmatprep.mubr.f32.mxu1 %v2257_v25 }
 0x1d0   : > { %v562_v9 = vmax.f32 %v483_v8, 0.0  ;;  %v485_v11 = vpop.f32.mrb[41].mxu0 }
 0x1d2   : > { %791 = vmatmul.mubr.f32.gmra.mrb[40].mxu1 %v562_v9 }
 0x1d3   : > { %v488_v13 = vpop.f32.mrb[42].mxu0  ;;  %796 = vmatprep.mubr.f32.mxu1 %v2257_v25 }
 0x1d4   : > { %v563_v14 = vmax.f32 %v488_v13, 0.0  ;;  %v490_v16 = vpop.f32.mrb[43].mxu0 }
 0x1d6   : > { %797 = vmatmul.mubr.f32.gmra.mrb[42].mxu1 %v563_v14 }
 0x1d7   : > { %v493_v17 = vpop.f32.mrb[44].mxu0  ;;  %802 = vmatprep.mubr.f32.mxu1 %v2257_v25 }
 0x1d8   : > { %v564_v18 = vmax.f32 %v493_v17, 0.0  ;;  %v495_v20 = vpop.f32.mrb[45].mxu0 }
 0x1da   : > { %803 = vmatmul.mubr.f32.gmra.mrb[44].mxu1 %v564_v18 }
 0x1db   : > { %v498_v21 = vpop.f32.mrb[46].mxu0  ;;  %808 = vmatprep.mubr.f32.mxu1 %v2257_v25 }
 0x1dc   : > { %v565_v22 = vmax.f32 %v498_v21, 0.0  ;;  %v500_v24 = vpop.f32.mrb[47].mxu0 }
 0x1de   : > { %809 = vmatmul.mubr.f32.gmra.mrb[46].mxu1 %v565_v22 }
 0x1df   : > { %v503_v26 = vpop.f32.mrb[48].mxu0  ;;  %814 = vmatprep.mubr.f32.mxu1 %v2257_v25 }
 0x1e0   : > { %v566_v28 = vmax.f32 %v503_v26, 0.0  ;;  %v505_v29 = vpop.f32.mrb[49].mxu0 }
 0x1e2   : > { %815 = vmatmul.mubr.f32.gmra.mrb[48].mxu1 %v566_v28 }
 0x1e3   : > { %v508_v30 = vpop.f32.mrb[50].mxu0  ;;  %820 = vmatprep.mubr.f32.mxu1 %v2257_v25 }
 0x1e4   : > { %v567_v32 = vmax.f32 %v508_v30, 0.0  ;;  %v510_v33 = vpop.f32.mrb[51].mxu0 }
 0x1e6   : > { %821 = vmatmul.mubr.f32.gmra.mrb[50].mxu1 %v567_v32 }
 0x1e7   : > { %v513_v34 = vpop.f32.mrb[52].mxu0  ;;  %826 = vmatprep.mubr.f32.mxu1 %v2257_v25 }
 0x1e8   : > { %v568_v36 = vmax.f32 %v513_v34, 0.0  ;;  %v515_v37 = vpop.f32.mrb[53].mxu0 }
 0x1ea   : > { %827 = vmatmul.mubr.f32.gmra.mrb[52].mxu1 %v568_v36 }
 0x1eb   : > { %v518_v38 = vpop.f32.mrb[54].mxu0  ;;  %832 = vmatprep.mubr.f32.mxu1 %v2257_v25 }
 0x1ec   : > { %v569_v40 = vmax.f32 %v518_v38, 0.0  ;;  %v520_v41 = vpop.f32.mrb[55].mxu0 }
 0x1ee   : > { %833 = vmatmul.mubr.f32.gmra.mrb[54].mxu1 %v569_v40 }
 0x1ef   : > { %v523_v42 = vpop.f32.mrb[56].mxu0  ;;  %838 = vmatprep.mubr.f32.mxu1 %v2257_v25 }
 0x1f0   : > { %v570_v44 = vmax.f32 %v523_v42, 0.0  ;;  %v525_v49 = vpop.f32.mrb[57].mxu0 }
 0x1f2   : > { %839 = vmatmul.mubr.f32.gmra.mrb[56].mxu1 %v570_v44 }
 0x1f3   : > { %v528_v52 = vpop.f32.mrb[58].mxu0  ;;  %844 = vmatprep.mubr.f32.mxu1 %v2257_v25 }
 0x1f4   : > { %v571_v53 = vmax.f32 %v528_v52, 0.0  ;;  %v530_v54 = vpop.f32.mrb[59].mxu0 }
 0x1f6   : > { %845 = vmatmul.mubr.f32.gmra.mrb[58].mxu1 %v571_v53 }
 0x1f7   : > { %v533_v55 = vpop.f32.mrb[60].mxu0  ;;  %850 = vmatprep.mubr.f32.mxu1 %v2257_v25 }
 0x1f8   : > { %v572_v56 = vmax.f32 %v533_v55, 0.0  ;;  %v535_v57 = vpop.f32.mrb[61].mxu0 }
 0x1fa   : > { %851 = vmatmul.mubr.f32.gmra.mrb[60].mxu1 %v572_v56 }
 0x1fb   : > { %v538_v58 = vpop.f32.mrb[62].mxu0  ;;  %856 = vmatprep.mubr.f32.mxu1 %v2257_v25 }
 0x1fc   : > { %v573_v59 = vmax.f32 %v538_v58, 0.0  ;;  %v540_v60 = vpop.f32.mrb[63].mxu0 }
 0x1fe   : > { %857 = vmatmul.mubr.f32.gmra.mrb[62].mxu1 %v573_v59 }
 0x255   : > { %v672_v61 = vpop.f32.mrb[0].mxu1 }
 0x256   : > { %v863_v62 = vadd.f32 %v672_v61, %v672_v61  ;;  %v674_v63 = vpop.f32.mrb[1].mxu1 }
 0x257   : > { %v864_v0 = vadd.f32 %v674_v63, %v674_v63 }
 0x258   : > { %v1560_v1 = vmul.f32 -1.442695, %v863_v62 }
 0x259   : > { %v1561_v3 = vmul.f32 -1.442695, %v864_v0  ;;  %v678_v4 = vpop.f32.mrb[2].mxu1 }
 0x25a   : > { %1789 = vpow2.f32 %v1560_v1  ;;  %v865_v5 = vadd.f32 %v678_v4, %v678_v4  ;;  %v680_v7 = vpop.f32.mrb[3].mxu1 }
 0x25b   : > { %1791 = vpow2.f32 %v1561_v3  ;;  %v866_v8 = vadd.f32 %v680_v7, %v680_v7 }
 0x25c   : > { %v1562_v9 = vmul.f32 -1.442695, %v865_v5 }
 0x25d   : > { %v1563_v11 = vmul.f32 -1.442695, %v866_v8  ;;  %v684_v13 = vpop.f32.mrb[4].mxu1 }
 0x25e   : > { %1793 = vpow2.f32 %v1562_v9  ;;  %v867_v25 = vadd.f32 %v684_v13, %v684_v13  ;;  %v686_v14 = vpop.f32.mrb[5].mxu1 }
 0x25f   : > { %1795 = vpow2.f32 %v1563_v11  ;;  %v868_v16 = vadd.f32 %v686_v14, %v686_v14 }
 0x260   : > { %v1564_v17 = vmul.f32 -1.442695, %v867_v25 }
 0x261   : > { %v1565_v18 = vmul.f32 -1.442695, %v868_v16  ;;  %v690_v20 = vpop.f32.mrb[6].mxu1 }
 0x262   : > { %1797 = vpow2.f32 %v1564_v17  ;;  %v869_v21 = vadd.f32 %v690_v20, %v690_v20  ;;  %v692_v22 = vpop.f32.mrb[7].mxu1 }
 0x263   : > { %1799 = vpow2.f32 %v1565_v18  ;;  %v870_v24 = vadd.f32 %v692_v22, %v692_v22 }
 0x264   : > { %v1790_v26 = vpop.eup %1789  ;;  %v1566_v28 = vmul.f32 -1.442695, %v869_v21 }
 0x265   : > { %v1792_v29 = vpop.eup %1791  ;;  %v1119_v30 = vadd.f32 1.0, %v1790_v26  ;;  %v1567_v32 = vmul.f32 -1.442695, %v870_v24  ;;  %v696_v33 = vpop.f32.mrb[8].mxu1 }
 0x266   : > { %v1120_v34 = vadd.f32 1.0, %v1792_v29  ;;  %1801 = vpow2.f32 %v1566_v28  ;;  %v871_v36 = vadd.f32 %v696_v33, %v696_v33  ;;  %v698_v37 = vpop.f32.mrb[9].mxu1 }
 0x267   : > { %1803 = vrcp.f32 %v1119_v30  ;;  %v872_v38 = vadd.f32 %v698_v37, %v698_v37 }
 0x268   : > { %v1794_v40 = vpop.eup %1793  ;;  %1805 = vrcp.f32 %v1120_v34  ;;  %v1568_v41 = vmul.f32 -1.442695, %v871_v36 }
 0x269   : > { %v1796_v42 = vpop.eup %1795  ;;  %v1121_v44 = vadd.f32 1.0, %v1794_v40  ;;  %1807 = vpow2.f32 %v1567_v32  ;;  %v1569_v49 = vmul.f32 -1.442695, %v872_v38  ;;  %v702_v52 = vpop.f32.mrb[10].mxu1 }
 0x26a   : > { %v1122_v53 = vadd.f32 1.0, %v1796_v42  ;;  %1809 = vpow2.f32 %v1568_v41  ;;  %v873_v54 = vadd.f32 %v702_v52, %v702_v52  ;;  %v704_v55 = vpop.f32.mrb[11].mxu1 }
 0x26b   : > { %1811 = vrcp.f32 %v1121_v44  ;;  %v874_v56 = vadd.f32 %v704_v55, %v704_v55 }
 0x26c   : > { %v1798_v57 = vpop.eup %1797  ;;  %1813 = vrcp.f32 %v1122_v53  ;;  %v1570_v58 = vmul.f32 -1.442695, %v873_v54 }
 0x26d   : > { %v1800_v59 = vpop.eup %1799  ;;  %v1123_v60 = vadd.f32 1.0, %v1798_v57  ;;  %1815 = vpow2.f32 %v1569_v49  ;;  %v1571_v61 = vmul.f32 -1.442695, %v874_v56  ;;  %v708_v62 = vpop.f32.mrb[12].mxu1 }
 0x26e   : > { %v1124_v63 = vadd.f32 1.0, %v1800_v59  ;;  %1817 = vpow2.f32 %v1570_v58  ;;  %v875_v0 = vadd.f32 %v708_v62, %v708_v62  ;;  %v710_v1 = vpop.f32.mrb[13].mxu1 }
 0x26f   : > { %1819 = vrcp.f32 %v1123_v60  ;;  %v876_v3 = vadd.f32 %v710_v1, %v710_v1 }
 0x270   : > { %v1802_v4 = vpop.eup %1801  ;;  %1821 = vrcp.f32 %v1124_v63  ;;  %v1572_v5 = vmul.f32 -1.442695, %v875_v0 }
 0x271   : > { %v1804_v7 = vpop.eup %1803  ;;  %v1125_v8 = vadd.f32 1.0, %v1802_v4  ;;  %1823 = vpow2.f32 %v1571_v61  ;;  %v1573_v9 = vmul.f32 -1.442695, %v876_v3  ;;  %v714_v11 = vpop.f32.mrb[14].mxu1 }
 0x272   : > { %v1806_v13 = vpop.eup %1805  ;;  %v1311_v25 = vmul.f32 %v1804_v7, %v2496_v50  ;;  %1825 = vpow2.f32 %v1572_v5  ;;  %v877_v14 = vadd.f32 %v714_v11, %v714_v11  ;;  %v716_v16 = vpop.f32.mrb[15].mxu1 }
 0x273   : > { %v1808_v17 = vpop.eup %1807  ;;  %v1312_v18 = vmul.f32 %v1806_v13, %v2479_v12  ;;  %1827 = vrcp.f32 %v1125_v8  ;;  %v878_v20 = vadd.f32 %v716_v16, %v716_v16 }
 0x274   : > { %v1810_v21 = vpop.eup %1809  ;;  %1375 = vst [vmem:[%s2645_s18] sm:$0xff] %v1311_v25  ;;  %v1126_v22 = vadd.f32 1.0, %v1808_v17  ;;  %1829 = vpow2.f32 %v1573_v9  ;;  %v1574_v24 = vmul.f32 -1.442695, %v877_v14 }
 0x275   : > { %v1812_v50 = vpop.eup %1811  ;;  %1376 = vst [vmem:[%s2645_s18 + $0x8] sm:$0xff] %v1312_v18  ;;  %v1127_v26 = vadd.f32 1.0, %v1810_v21  ;;  %v1575_v28 = vmul.f32 -1.442695, %v878_v20  ;;  %v720_v29 = vpop.f32.mrb[16].mxu1 }
 0x276   : > { %v1814_v12 = vpop.eup %1813  ;;  %v1313_v30 = vmul.f32 %v1812_v50, %v2504_v2  ;;  %1831 = vrcp.f32 %v1126_v22  ;;  %v879_v32 = vadd.f32 %v720_v29, %v720_v29  ;;  %v722_v33 = vpop.f32.mrb[17].mxu1 }
 0x277   : > { %v1816_v34 = vpop.eup %1815  ;;  %v1314_v36 = vmul.f32 %v1814_v12, %v2499_v51  ;;  %1833 = vrcp.f32 %v1127_v26  ;;  %v880_v37 = vadd.f32 %v722_v33, %v722_v33 }
 0x278   : > { %v1818_v38 = vpop.eup %1817  ;;  %1377 = vst [vmem:[%s2645_s18 + $0x10] sm:$0xff] %v1313_v30  ;;  %v1128_v40 = vadd.f32 1.0, %v1816_v34  ;;  %1835 = vpow2.f32 %v1574_v24  ;;  %v1576_v41 = vmul.f32 -1.442695, %v879_v32 }
 0x279   : > { %v1820_v42 = vpop.eup %1819  ;;  %1378 = vst [vmem:[%s2645_s18 + $0x18] sm:$0xff] %v1314_v36  ;;  %v1129_v44 = vadd.f32 1.0, %v1818_v38  ;;  %1837 = vpow2.f32 %v1575_v28  ;;  %v1577_v49 = vmul.f32 -1.442695, %v880_v37  ;;  %v726_v2 = vpop.f32.mrb[18].mxu1 }
 0x27a   : > { %v1822_v52 = vpop.eup %1821  ;;  %v1315_v53 = vmul.f32 %v1820_v42, %v2512_v10  ;;  %1839 = vrcp.f32 %v1128_v40  ;;  %v881_v51 = vadd.f32 %v726_v2, %v726_v2  ;;  %v728_v54 = vpop.f32.mrb[19].mxu1 }
 0x27b   : > { %v1824_v55 = vpop.eup %1823  ;;  %v1316_v56 = vmul.f32 %v1822_v52, %v2507_v6  ;;  %1841 = vrcp.f32 %v1129_v44  ;;  %v882_v57 = vadd.f32 %v728_v54, %v728_v54 }
 0x27c   : > { %v1826_v58 = vpop.eup %1825  ;;  %1379 = vst [vmem:[%s2645_s18 + $0x20] sm:$0xff] %v1315_v53  ;;  %v1130_v59 = vadd.f32 1.0, %v1824_v55  ;;  %1843 = vpow2.f32 %v1576_v41  ;;  %v1578_v60 = vmul.f32 -1.442695, %v881_v51 }
 0x27d   : > { %v1828_v61 = vpop.eup %1827  ;;  %1380 = vst [vmem:[%s2645_s18 + $0x28] sm:$0xff] %v1316_v56  ;;  %v1131_v62 = vadd.f32 1.0, %v1826_v58  ;;  %1845 = vpow2.f32 %v1577_v49  ;;  %v732_v63 = vpop.f32.mrb[20].mxu1  ;;  %v1579_v1 = vmul.f32 -1.442695, %v882_v57 }
 0x27e   : > { %v1830_v10 = vpop.eup %1829  ;;  %v1317_v0 = vmul.f32 %v1828_v61, %v2520_v19  ;;  %1847 = vrcp.f32 %v1130_v59  ;;  %v883_v3 = vadd.f32 %v732_v63, %v732_v63  ;;  %v734_v6 = vpop.f32.mrb[21].mxu1 }
 0x27f   : > { %1849 = vrcp.f32 %v1131_v62  ;;  %v1132_v4 = vadd.f32 1.0, %v1830_v10  ;;  %v884_v5 = vadd.f32 %v734_v6, %v734_v6 }
 0x280   : > { %v1832_v7 = vpop.eup %1831  ;;  %1381 = vst [vmem:[%s2645_s18 + $0x30] sm:$0xff] %v1317_v0  ;;  %1851 = vpow2.f32 %v1578_v60  ;;  %v1580_v8 = vmul.f32 -1.442695, %v883_v3 }
 0x281   : > { %v1834_v9 = vpop.eup %1833  ;;  %v1318_v11 = vmul.f32 %v1832_v7, %v2515_v15  ;;  %1853 = vrcp.f32 %v1132_v4  ;;  %v1581_v13 = vmul.f32 -1.442695, %v884_v5  ;;  %v738_v25 = vpop.f32.mrb[22].mxu1 }
 0x282   : > { %v1836_v19 = vpop.eup %1835  ;;  %v1319_v14 = vmul.f32 %v1834_v9, %v2528_v27  ;;  %1855 = vpow2.f32 %v1579_v1  ;;  %v885_v16 = vadd.f32 %v738_v25, %v738_v25  ;;  %v740_v17 = vpop.f32.mrb[23].mxu1 }
 0x283   : > { %v1838_v18 = vpop.eup %1837  ;;  %1382 = vst [vmem:[%s2645_s18 + $0x38] sm:$0xff] %v1318_v11  ;;  %v1133_v20 = vadd.f32 1.0, %v1836_v19  ;;  %1857 = vpow2.f32 %v1580_v8  ;;  %v886_v21 = vadd.f32 %v740_v17, %v740_v17 }
 0x284   : > { %v1840_v22 = vpop.eup %1839  ;;  %1383 = vst [vmem:[%s2645_s18 + $0x40] sm:$0xff] %v1319_v14  ;;  %v1134_v24 = vadd.f32 1.0, %v1838_v18  ;;  %1859 = vpow2.f32 %v1581_v13  ;;  %v1582_v15 = vmul.f32 -1.442695, %v885_v16 }
 0x285   : > { %v1842_v50 = vpop.eup %1841  ;;  %v1320_v26 = vmul.f32 %v1840_v22, %v2523_v23  ;;  %1861 = vrcp.f32 %v1133_v20  ;;  %v1583_v27 = vmul.f32 -1.442695, %v886_v21  ;;  %v744_v28 = vpop.f32.mrb[24].mxu1 }
 0x286   : > { %v1844_v29 = vpop.eup %1843  ;;  %v1321_v12 = vmul.f32 %v1842_v50, %v2536_v35  ;;  %1863 = vrcp.f32 %v1134_v24  ;;  %v887_v30 = vadd.f32 %v744_v28, %v744_v28  ;;  %v746_v32 = vpop.f32.mrb[25].mxu1 }
 0x287   : > { %v1846_v33 = vpop.eup %1845  ;;  %1384 = vst [vmem:[%s2645_s18 + $0x48] sm:$0xff] %v1320_v26  ;;  %v1135_v34 = vadd.f32 1.0, %v1844_v29  ;;  %1865 = vpow2.f32 %v1582_v15  ;;  %v888_v36 = vadd.f32 %v746_v32, %v746_v32 }
 0x288   : > { %v1848_v37 = vpop.eup %1847  ;;  %1385 = vst [vmem:[%s2645_s18 + $0x50] sm:$0xff] %v1321_v12  ;;  %v1136_v38 = vadd.f32 1.0, %v1846_v33  ;;  %1867 = vpow2.f32 %v1583_v27  ;;  %v1584_v23 = vmul.f32 -1.442695, %v887_v30  ;;  %v2045_v12 = vld [vmem:[%s2465_s28 + $0x90] sm:$0xff] }
 0x289   : > { %v1850_v40 = vpop.eup %1849  ;;  %v1322_v41 = vmul.f32 %v1848_v37, %v2531_v31  ;;  %1869 = vrcp.f32 %v1135_v34  ;;  %v1585_v35 = vmul.f32 -1.442695, %v888_v36  ;;  %v750_v42 = vpop.f32.mrb[26].mxu1 }
 0x28a   : > { %v1852_v44 = vpop.eup %1851  ;;  %v1323_v49 = vmul.f32 %v1850_v40, %v2544_v43  ;;  %1871 = vrcp.f32 %v1136_v38  ;;  %v889_v2 = vadd.f32 %v750_v42, %v750_v42  ;;  %v752_v52 = vpop.f32.mrb[27].mxu1  ;;  %v2046_v38 = vld [vmem:[%s2465_s28 + $0x98] sm:$0xff]  ;;  %v2047_v42 = vld [vmem:[%s2465_s28 + $0xa0] sm:$0xff] }
 0x28b   : > { %v1854_v53 = vpop.eup %1853  ;;  %1386 = vst [vmem:[%s2645_s18 + $0x58] sm:$0xff] %v1322_v41  ;;  %v1137_v51 = vadd.f32 1.0, %v1852_v44  ;;  %1873 = vpow2.f32 %v1584_v23  ;;  %v890_v54 = vadd.f32 %v752_v52, %v752_v52  ;;  %v2048_v52 = vld [vmem:[%s2465_s28 + $0xa8] sm:$0xff] }
 0x28c   : > { %v1856_v55 = vpop.eup %1855  ;;  %1387 = vst [vmem:[%s2645_s18 + $0x60] sm:$0xff] %v1323_v49  ;;  %v1324_v56 = vmul.f32 %v1854_v53, %v2539_v39  ;;  %1875 = vpow2.f32 %v1585_v35  ;;  %v1586_v31 = vmul.f32 -1.442695, %v889_v2 }
 0x28d   : > { %v1858_v57 = vpop.eup %1857  ;;  %1877 = vrcp.f32 %v1137_v51  ;;  %v1138_v58 = vadd.f32 1.0, %v1856_v55  ;;  %v756_v59 = vpop.f32.mrb[28].mxu1  ;;  %v1587_v61 = vmul.f32 -1.442695, %v890_v54 }
 0x28e   : > { %v1860_v43 = vpop.eup %1859  ;;  %1388 = vst [vmem:[%s2645_s18 + $0x68] sm:$0xff] %v1324_v56  ;;  %v1139_v60 = vadd.f32 1.0, %v1858_v57  ;;  %1879 = vpow2.f32 %v1586_v31  ;;  %v891_v62 = vadd.f32 %v756_v59, %v756_v59  ;;  %v758_v63 = vpop.f32.mrb[29].mxu1 }
 0x28f   : > { %v1862_v10 = vpop.eup %1861  ;;  %1881 = vrcp.f32 %v1138_v58  ;;  %v1140_v0 = vadd.f32 1.0, %v1860_v43  ;;  %v892_v1 = vadd.f32 %v758_v63, %v758_v63 }
 0x290   : > { %v1864_v3 = vpop.eup %1863  ;;  %v1325_v39 = vmul.f32 %v1862_v10, %v2552_v46  ;;  %1883 = vrcp.f32 %v1139_v60  ;;  %v1588_v6 = vmul.f32 -1.442695, %v891_v62 }
 0x291   : > { %v1866_v4 = vpop.eup %1865  ;;  %v1326_v5 = vmul.f32 %v1864_v3, %v2547_v45  ;;  %1885 = vrcp.f32 %v1140_v0  ;;  %v762_v7 = vpop.f32.mrb[30].mxu1  ;;  %v1589_v11 = vmul.f32 -1.442695, %v892_v1  ;;  %v2050_v0 = vld [vmem:[%s2465_s28 + $0xb8] sm:$0xff] }
 0x292   : > { %v1868_v8 = vpop.eup %1867  ;;  %1389 = vst [vmem:[%s2645_s18 + $0x70] sm:$0xff] %v1325_v39  ;;  %v1141_v9 = vadd.f32 1.0, %v1866_v4  ;;  %1887 = vpow2.f32 %v1587_v61  ;;  %v893_v13 = vadd.f32 %v762_v7, %v762_v7  ;;  %v764_v25 = vpop.f32.mrb[31].mxu1  ;;  %v2049_v61 = vld [vmem:[%s2465_s28 + $0xb0] sm:$0xff] }
 0x293   : > { %v1870_v19 = vpop.eup %1869  ;;  %1390 = vst [vmem:[%s2645_s18 + $0x78] sm:$0xff] %v1326_v5  ;;  %v1142_v14 = vadd.f32 1.0, %v1868_v8  ;;  %1889 = vpow2.f32 %v1588_v6  ;;  %v894_v46 = vadd.f32 %v764_v25, %v764_v25  ;;  %v2051_v25 = vld [vmem:[%s2465_s28 + $0xc0] sm:$0xff] }
 0x294   : > { %v1872_v16 = vpop.eup %1871  ;;  %v1327_v17 = vmul.f32 %v1870_v19, %v2560_v48  ;;  %1891 = vrcp.f32 %v1141_v9  ;;  %v1590_v45 = vmul.f32 -1.442695, %v893_v13 }
 0x295   : > { %v1874_v18 = vpop.eup %1873  ;;  %v1328_v20 = vmul.f32 %v1872_v16, %v2555_v47  ;;  %1893 = vrcp.f32 %v1142_v14  ;;  %v768_v21 = vpop.f32.mrb[32].mxu1  ;;  %v1591_v15 = vmul.f32 -1.442695, %v894_v46  ;;  %v2052_v16 = vld [vmem:[%s2465_s28 + $0xc8] sm:$0xff] }
 0x296   : > { %v1876_v22 = vpop.eup %1875  ;;  %1391 = vst [vmem:[%s2645_s18 + $0x80] sm:$0xff] %v1327_v17  ;;  %v1143_v24 = vadd.f32 1.0, %v1874_v18  ;;  %1895 = vpow2.f32 %v1589_v11  ;;  %v895_v50 = vadd.f32 %v768_v21, %v768_v21  ;;  %v770_v26 = vpop.f32.mrb[33].mxu1 }
 0x297   : > { %v1878_v27 = vpop.eup %1877  ;;  %1392 = vst [vmem:[%s2645_s18 + $0x88] sm:$0xff] %v1328_v20  ;;  %v1144_v48 = vadd.f32 1.0, %v1876_v22  ;;  %1897 = vpow2.f32 %v1590_v45  ;;  %v896_v28 = vadd.f32 %v770_v26, %v770_v26 }
 0x298   : > { %v1880_v29 = vpop.eup %1879  ;;  %v1329_v47 = vmul.f32 %v2045_v12, %v1878_v27  ;;  %1899 = vrcp.f32 %v1143_v24  ;;  %v1592_v30 = vmul.f32 -1.442695, %v895_v50 }
 0x299   : > { %v1882_v32 = vpop.eup %1881  ;;  %1901 = vrcp.f32 %v1144_v48  ;;  %v1145_v33 = vadd.f32 1.0, %v1880_v29  ;;  %v1593_v34 = vmul.f32 -1.442695, %v896_v28  ;;  %v774_v36 = vpop.f32.mrb[34].mxu1 }
 0x29a   : > { %v1884_v37 = vpop.eup %1883  ;;  %1393 = vst [vmem:[%s2645_s18 + $0x90] sm:$0xff] %v1329_v47  ;;  %v1330_v23 = vmul.f32 %v2046_v38, %v1882_v32  ;;  %1903 = vpow2.f32 %v1591_v15  ;;  %v897_v40 = vadd.f32 %v774_v36, %v774_v36  ;;  %v776_v41 = vpop.f32.mrb[35].mxu1  ;;  %v2053_v15 = vld [vmem:[%s2465_s28 + $0xd0] sm:$0xff]  ;;  %v2054_v38 = vld [vmem:[%s2465_s28 + $0xd8] sm:$0xff] }
 0x29b   : > { %v1886_v35 = vpop.eup %1885  ;;  %v1331_v44 = vmul.f32 %v2047_v42, %v1884_v37  ;;  %1905 = vrcp.f32 %v1145_v33  ;;  %v898_v49 = vadd.f32 %v776_v41, %v776_v41  ;;  %v2055_v42 = vld [vmem:[%s2465_s28 + $0xe0] sm:$0xff] }
 0x29c   : > { %v1888_v2 = vpop.eup %1887  ;;  %1394 = vst [vmem:[%s2645_s18 + $0x98] sm:$0xff] %v1330_v23  ;;  %v1332_v53 = vmul.f32 %v2048_v52, %v1886_v35  ;;  %1907 = vpow2.f32 %v1592_v30  ;;  %v1594_v51 = vmul.f32 -1.442695, %v897_v40 }
 0x29d   : > { %v1890_v54 = vpop.eup %1889  ;;  %1395 = vst [vmem:[%s2645_s18 + $0xa0] sm:$0xff] %v1331_v44  ;;  %v1146_v55 = vadd.f32 1.0, %v1888_v2  ;;  %1909 = vpow2.f32 %v1593_v34  ;;  %v1595_v56 = vmul.f32 -1.442695, %v898_v49  ;;  %v780_v31 = vpop.f32.mrb[36].mxu1 }
 0x29e   : > { %v1892_v57 = vpop.eup %1891  ;;  %1396 = vst [vmem:[%s2645_s18 + $0xa8] sm:$0xff] %v1332_v53  ;;  %v1147_v58 = vadd.f32 1.0, %v1890_v54  ;;  %1911 = vpow2.f32 %v1594_v51  ;;  %v899_v59 = vadd.f32 %v780_v31, %v780_v31  ;;  %v782_v43 = vpop.f32.mrb[37].mxu1 }
 0x29f   : > { %v1894_v60 = vpop.eup %1893  ;;  %v1333_v62 = vmul.f32 %v2049_v61, %v1892_v57  ;;  %1913 = vrcp.f32 %v1146_v55  ;;  %v900_v63 = vadd.f32 %v782_v43, %v782_v43  ;;  %v2056_v57 = vld [vmem:[%s2465_s28 + $0xe8] sm:$0xff]  ;;  %v2057_v61 = vld [vmem:[%s2465_s28 + $0xf0] sm:$0xff] }
 0x2a0   : > { %v1896_v10 = vpop.eup %1895  ;;  %v1334_v1 = vmul.f32 %v2050_v0, %v1894_v60  ;;  %1915 = vrcp.f32 %v1147_v58  ;;  %v1596_v3 = vmul.f32 -1.442695, %v899_v59 }
 0x2a1   : > { %v1898_v39 = vpop.eup %1897  ;;  %1397 = vst [vmem:[%s2645_s18 + $0xb0] sm:$0xff] %v1333_v62  ;;  %v1148_v6 = vadd.f32 1.0, %v1896_v10  ;;  %1917 = vpow2.f32 %v1595_v56  ;;  %v1597_v4 = vmul.f32 -1.442695, %v900_v63  ;;  %v786_v5 = vpop.f32.mrb[38].mxu1 }
 0x2a2   : > { %v1900_v7 = vpop.eup %1899  ;;  %1398 = vst [vmem:[%s2645_s18 + $0xb8] sm:$0xff] %v1334_v1  ;;  %v1149_v8 = vadd.f32 1.0, %v1898_v39  ;;  %1919 = vpow2.f32 %v1596_v3  ;;  %v901_v9 = vadd.f32 %v786_v5, %v786_v5  ;;  %v788_v11 = vpop.f32.mrb[39].mxu1  ;;  %v2058_v5 = vld [vmem:[%s2465_s28 + $0xf8] sm:$0xff] }
 0x2a3   : > { %v1902_v13 = vpop.eup %1901  ;;  %v1335_v19 = vmul.f32 %v2051_v25, %v1900_v7  ;;  %1921 = vrcp.f32 %v1148_v6  ;;  %v902_v14 = vadd.f32 %v788_v11, %v788_v11 }
 0x2a4   : > { %v1904_v46 = vpop.eup %1903  ;;  %v1336_v17 = vmul.f32 %v2052_v16, %v1902_v13  ;;  %1923 = vrcp.f32 %v1149_v8  ;;  %v1598_v45 = vmul.f32 -1.442695, %v901_v9 }
 0x2a5   : > { %v1906_v18 = vpop.eup %1905  ;;  %1399 = vst [vmem:[%s2645_s18 + $0xc0] sm:$0xff] %v1335_v19  ;;  %v1150_v20 = vadd.f32 1.0, %v1904_v46  ;;  %1925 = vpow2.f32 %v1597_v4  ;;  %v1599_v21 = vmul.f32 -1.442695, %v902_v14  ;;  %v792_v22 = vpop.f32.mrb[40].mxu1  ;;  %v2059_v46 = vld [vmem:[%s2465_s28 + $0x100] sm:$0xff] }
 0x2a6   : > { %v1908_v24 = vpop.eup %1907  ;;  %1400 = vst [vmem:[%s2645_s18 + $0xc8] sm:$0xff] %v1336_v17  ;;  %v1337_v50 = vmul.f32 %v2053_v15, %v1906_v18  ;;  %1927 = vpow2.f32 %v1598_v45  ;;  %v903_v26 = vadd.f32 %v792_v22, %v792_v22  ;;  %v794_v27 = vpop.f32.mrb[41].mxu1  ;;  %v2060_v18 = vld [vmem:[%s2465_s28 + $0x108] sm:$0xff]  ;;  %v2061_v15 = vld [vmem:[%s2465_s28 + $0x110] sm:$0xff] }
 0x2a7   : > { %v1910_v48 = vpop.eup %1909  ;;  %1929 = vrcp.f32 %v1150_v20  ;;  %v1151_v28 = vadd.f32 1.0, %v1908_v24  ;;  %v904_v29 = vadd.f32 %v794_v27, %v794_v27 }
 0x2a8   : > { %v1912_v12 = vpop.eup %1911  ;;  %1401 = vst [vmem:[%s2645_s18 + $0xd0] sm:$0xff] %v1337_v50  ;;  %v1152_v47 = vadd.f32 1.0, %v1910_v48  ;;  %1931 = vpow2.f32 %v1599_v21  ;;  %v1600_v30 = vmul.f32 -1.442695, %v903_v26 }
 0x2a9   : > { %v1914_v32 = vpop.eup %1913  ;;  %1933 = vrcp.f32 %v1151_v28  ;;  %v1153_v33 = vadd.f32 1.0, %v1912_v12  ;;  %v1601_v34 = vmul.f32 -1.442695, %v904_v29  ;;  %v798_v36 = vpop.f32.mrb[42].mxu1 }
 0x2aa   : > { %v1916_v37 = vpop.eup %1915  ;;  %v1338_v23 = vmul.f32 %v2054_v38, %v1914_v32  ;;  %1935 = vrcp.f32 %v1152_v47  ;;  %v905_v40 = vadd.f32 %v798_v36, %v798_v36  ;;  %v800_v41 = vpop.f32.mrb[43].mxu1 }
 0x2ab   : > { %v1918_v35 = vpop.eup %1917  ;;  %v1339_v44 = vmul.f32 %v2055_v42, %v1916_v37  ;;  %1937 = vrcp.f32 %v1153_v33  ;;  %v906_v49 = vadd.f32 %v800_v41, %v800_v41  ;;  %v2062_v33 = vld [vmem:[%s2465_s28 + $0x118] sm:$0xff] }
 0x2ac   : > { %v1920_v2 = vpop.eup %1919  ;;  %1402 = vst [vmem:[%s2645_s18 + $0xd8] sm:$0xff] %v1338_v23  ;;  %v1154_v52 = vadd.f32 1.0, %v1918_v35  ;;  %1939 = vpow2.f32 %v1600_v30  ;;  %v1602_v53 = vmul.f32 -1.442695, %v905_v40  ;;  %v2063_v23 = vld [vmem:[%s2465_s28 + $0x120] sm:$0xff] }
 0x2ad   : > { %v1922_v51 = vpop.eup %1921  ;;  %1403 = vst [vmem:[%s2645_s18 + $0xe0] sm:$0xff] %v1339_v44  ;;  %v1155_v54 = vadd.f32 1.0, %v1920_v2  ;;  %1941 = vpow2.f32 %v1601_v34  ;;  %v1603_v55 = vmul.f32 -1.442695, %v906_v49  ;;  %v804_v56 = vpop.f32.mrb[44].mxu1 }
 0x2ae   : > { %v1924_v31 = vpop.eup %1923  ;;  %v1340_v58 = vmul.f32 %v2056_v57, %v1922_v51  ;;  %1943 = vrcp.f32 %v1154_v52  ;;  %v907_v59 = vadd.f32 %v804_v56, %v804_v56  ;;  %v806_v43 = vpop.f32.mrb[45].mxu1 }
 0x2af   : > { %v1926_v60 = vpop.eup %1925  ;;  %v1341_v62 = vmul.f32 %v2057_v61, %v1924_v31  ;;  %1945 = vrcp.f32 %v1155_v54  ;;  %v908_v63 = vadd.f32 %v806_v43, %v806_v43  ;;  %v2064_v54 = vld [vmem:[%s2465_s28 + $0x128] sm:$0xff] }
 0x2b0   : > { %v1928_v10 = vpop.eup %1927  ;;  %1404 = vst [vmem:[%s2645_s18 + $0xe8] sm:$0xff] %v1340_v58  ;;  %v1156_v0 = vadd.f32 1.0, %v1926_v60  ;;  %1947 = vpow2.f32 %v1602_v53  ;;  %v1604_v1 = vmul.f32 -1.442695, %v907_v59  ;;  %v2065_v58 = vld [vmem:[%s2465_s28 + $0x130] sm:$0xff] }
 0x2b1   : > { %v1930_v3 = vpop.eup %1929  ;;  %1405 = vst [vmem:[%s2645_s18 + $0xf0] sm:$0xff] %v1341_v62  ;;  %v1157_v39 = vadd.f32 1.0, %v1928_v10  ;;  %1949 = vpow2.f32 %v1603_v55  ;;  %v810_v6 = vpop.f32.mrb[46].mxu1  ;;  %v1605_v8 = vmul.f32 -1.442695, %v908_v63 }
 0x2b2   : > { %v1932_v4 = vpop.eup %1931  ;;  %v1342_v7 = vmul.f32 %v2058_v5, %v1930_v3  ;;  %1951 = vrcp.f32 %v1156_v0  ;;  %v909_v9 = vadd.f32 %v810_v6, %v810_v6  ;;  %v812_v11 = vpop.f32.mrb[47].mxu1  ;;  %v2066_v0 = vld [vmem:[%s2465_s28 + $0x138] sm:$0xff] }
 0x2b3   : > { %v1934_v13 = vpop.eup %1933  ;;  %1953 = vrcp.f32 %v1157_v39  ;;  %v1158_v25 = vadd.f32 1.0, %v1932_v4  ;;  %v910_v19 = vadd.f32 %v812_v11, %v812_v11 }
 0x2b4   : > { %v1936_v14 = vpop.eup %1935  ;;  %1406 = vst [vmem:[%s2645_s18 + $0xf8] sm:$0xff] %v1342_v7  ;;  %v1343_v16 = vmul.f32 %v2059_v46, %v1934_v13  ;;  %1955 = vpow2.f32 %v1604_v1  ;;  %v1606_v17 = vmul.f32 -1.442695, %v909_v9  ;;  %v2067_v46 = vld [vmem:[%s2465_s28 + $0x140] sm:$0xff] }
 0x2b5   : > { %v1938_v45 = vpop.eup %1937  ;;  %v1344_v20 = vmul.f32 %v2060_v18, %v1936_v14  ;;  %1957 = vrcp.f32 %v1158_v25  ;;  %v1607_v21 = vmul.f32 -1.442695, %v910_v19  ;;  %v816_v22 = vpop.f32.mrb[48].mxu1  ;;  %v2068_v18 = vld [vmem:[%s2465_s28 + $0x148] sm:$0xff] }
 0x2b6   : > { %v1940_v24 = vpop.eup %1939  ;;  %1407 = vst [vmem:[%s2645_s18 + $0x100] sm:$0xff] %v1343_v16  ;;  %v1345_v50 = vmul.f32 %v2061_v15, %v1938_v45  ;;  %1959 = vpow2.f32 %v1605_v8  ;;  %v911_v26 = vadd.f32 %v816_v22, %v816_v22  ;;  %v818_v27 = vpop.f32.mrb[49].mxu1 }
 0x2b7   : > { %v1942_v48 = vpop.eup %1941  ;;  %1408 = vst [vmem:[%s2645_s18 + $0x108] sm:$0xff] %v1344_v20  ;;  %v1159_v28 = vadd.f32 1.0, %v1940_v24  ;;  %1961 = vpow2.f32 %v1606_v17  ;;  %v912_v29 = vadd.f32 %v818_v27, %v818_v27 }
 0x2b8   : > { %v1944_v12 = vpop.eup %1943  ;;  %1409 = vst [vmem:[%s2645_s18 + $0x110] sm:$0xff] %v1345_v50  ;;  %v1160_v47 = vadd.f32 1.0, %v1942_v48  ;;  %1963 = vpow2.f32 %v1607_v21  ;;  %v1608_v30 = vmul.f32 -1.442695, %v911_v26 }
 0x2b9   : > { %v1946_v32 = vpop.eup %1945  ;;  %v1346_v34 = vmul.f32 %v2062_v33, %v1944_v12  ;;  %1965 = vrcp.f32 %v1159_v28  ;;  %v1609_v36 = vmul.f32 -1.442695, %v912_v29  ;;  %v822_v37 = vpop.f32.mrb[50].mxu1  ;;  %v2069_v12 = vld [vmem:[%s2465_s28 + $0x150] sm:$0xff]  ;;  %v2070_v33 = vld [vmem:[%s2465_s28 + $0x158] sm:$0xff] }
 0x2ba   : > { %v1948_v38 = vpop.eup %1947  ;;  %v1347_v40 = vmul.f32 %v2063_v23, %v1946_v32  ;;  %1967 = vrcp.f32 %v1160_v47  ;;  %v913_v41 = vadd.f32 %v822_v37, %v822_v37  ;;  %v824_v35 = vpop.f32.mrb[51].mxu1 }
 0x2bb   : > { %v1950_v42 = vpop.eup %1949  ;;  %1410 = vst [vmem:[%s2645_s18 + $0x118] sm:$0xff] %v1346_v34  ;;  %v1161_v44 = vadd.f32 1.0, %v1948_v38  ;;  %1969 = vpow2.f32 %v1608_v30  ;;  %v914_v49 = vadd.f32 %v824_v35, %v824_v35 }
 0x2bc   : > { %v1952_v2 = vpop.eup %1951  ;;  %1411 = vst [vmem:[%s2645_s18 + $0x120] sm:$0xff] %v1347_v40  ;;  %v1162_v52 = vadd.f32 1.0, %v1950_v42  ;;  %1971 = vpow2.f32 %v1609_v36  ;;  %v1610_v53 = vmul.f32 -1.442695, %v913_v41 }
 0x2bd   : > { %v1954_v51 = vpop.eup %1953  ;;  %v1348_v55 = vmul.f32 %v2064_v54, %v1952_v2  ;;  %1973 = vrcp.f32 %v1161_v44  ;;  %v1611_v56 = vmul.f32 -1.442695, %v914_v49  ;;  %v828_v31 = vpop.f32.mrb[52].mxu1  ;;  %v2071_v2 = vld [vmem:[%s2465_s28 + $0x160] sm:$0xff] }
 0x2be   : > { %v1956_v57 = vpop.eup %1955  ;;  %v1349_v59 = vmul.f32 %v2065_v58, %v1954_v51  ;;  %1975 = vrcp.f32 %v1162_v52  ;;  %v915_v43 = vadd.f32 %v828_v31, %v828_v31  ;;  %v830_v60 = vpop.f32.mrb[53].mxu1 }
 0x2bf   : > { %v1958_v61 = vpop.eup %1957  ;;  %1412 = vst [vmem:[%s2645_s18 + $0x128] sm:$0xff] %v1348_v55  ;;  %v1163_v62 = vadd.f32 1.0, %v1956_v57  ;;  %1977 = vpow2.f32 %v1610_v53  ;;  %v916_v63 = vadd.f32 %v830_v60, %v830_v60  ;;  %v2072_v57 = vld [vmem:[%s2465_s28 + $0x168] sm:$0xff] }
 0x2c0   : > { %v1960_v10 = vpop.eup %1959  ;;  %1413 = vst [vmem:[%s2645_s18 + $0x130] sm:$0xff] %v1349_v59  ;;  %v1350_v1 = vmul.f32 %v2066_v0, %v1958_v61  ;;  %1979 = vpow2.f32 %v1611_v56  ;;  %v1612_v3 = vmul.f32 -1.442695, %v915_v43  ;;  %v2073_v61 = vld [vmem:[%s2465_s28 + $0x170] sm:$0xff]  ;;  %v2074_v0 = vld [vmem:[%s2465_s28 + $0x178] sm:$0xff] }
 0x2c1   : > { %v1962_v39 = vpop.eup %1961  ;;  %1981 = vrcp.f32 %v1163_v62  ;;  %v1164_v6 = vadd.f32 1.0, %v1960_v10  ;;  %v834_v4 = vpop.f32.mrb[54].mxu1  ;;  %v1613_v8 = vmul.f32 -1.442695, %v916_v63 }
 0x2c2   : > { %v1964_v5 = vpop.eup %1963  ;;  %1414 = vst [vmem:[%s2645_s18 + $0x138] sm:$0xff] %v1350_v1  ;;  %v1165_v7 = vadd.f32 1.0, %v1962_v39  ;;  %1983 = vpow2.f32 %v1612_v3  ;;  %v917_v9 = vadd.f32 %v834_v4, %v834_v4  ;;  %v836_v11 = vpop.f32.mrb[55].mxu1 }
 0x2c3   : > { %v1966_v13 = vpop.eup %1965  ;;  %1985 = vrcp.f32 %v1164_v6  ;;  %v1166_v25 = vadd.f32 1.0, %v1964_v5  ;;  %v918_v19 = vadd.f32 %v836_v11, %v836_v11 }
 0x2c4   : > { %v1968_v14 = vpop.eup %1967  ;;  %v1351_v16 = vmul.f32 %v2067_v46, %v1966_v13  ;;  %1987 = vrcp.f32 %v1165_v7  ;;  %v1614_v17 = vmul.f32 -1.442695, %v917_v9 }
 0x2c5   : > { %v1970_v45 = vpop.eup %1969  ;;  %v1352_v20 = vmul.f32 %v2068_v18, %v1968_v14  ;;  %1989 = vrcp.f32 %v1166_v25  ;;  %v840_v21 = vpop.f32.mrb[56].mxu1  ;;  %v1615_v15 = vmul.f32 -1.442695, %v918_v19  ;;  %v2075_v25 = vld [vmem:[%s2465_s28 + $0x180] sm:$0xff] }
 0x2c6   : > { %v1972_v22 = vpop.eup %1971  ;;  %1415 = vst [vmem:[%s2645_s18 + $0x140] sm:$0xff] %v1351_v16  ;;  %v1167_v24 = vadd.f32 1.0, %v1970_v45  ;;  %1991 = vpow2.f32 %v1613_v8  ;;  %v919_v50 = vadd.f32 %v840_v21, %v840_v21  ;;  %v842_v26 = vpop.f32.mrb[57].mxu1  ;;  %v2076_v16 = vld [vmem:[%s2465_s28 + $0x188] sm:$0xff] }
 0x2c7   : > { %v1974_v27 = vpop.eup %1973  ;;  %1416 = vst [vmem:[%s2645_s18 + $0x148] sm:$0xff] %v1352_v20  ;;  %v1168_v48 = vadd.f32 1.0, %v1972_v22  ;;  %1993 = vpow2.f32 %v1614_v17  ;;  %v920_v28 = vadd.f32 %v842_v26, %v842_v26 }
 0x2c8   : > { %v1976_v29 = vpop.eup %1975  ;;  %v1353_v47 = vmul.f32 %v2069_v12, %v1974_v27  ;;  %1995 = vrcp.f32 %v1167_v24  ;;  %v1616_v30 = vmul.f32 -1.442695, %v919_v50  ;;  %v2077_v50 = vld [vmem:[%s2465_s28 + $0x190] sm:$0xff] }
 0x2c9   : > { %v1978_v32 = vpop.eup %1977  ;;  %v1354_v34 = vmul.f32 %v2070_v33, %v1976_v29  ;;  %1997 = vrcp.f32 %v1168_v48  ;;  %v846_v36 = vpop.f32.mrb[58].mxu1  ;;  %v1617_v23 = vmul.f32 -1.442695, %v920_v28  ;;  %v2078_v48 = vld [vmem:[%s2465_s28 + $0x198] sm:$0xff] }
 0x2ca   : > { %v1980_v37 = vpop.eup %1979  ;;  %1417 = vst [vmem:[%s2645_s18 + $0x150] sm:$0xff] %v1353_v47  ;;  %v1169_v38 = vadd.f32 1.0, %v1978_v32  ;;  %1999 = vpow2.f32 %v1615_v15  ;;  %v921_v40 = vadd.f32 %v846_v36, %v846_v36  ;;  %v848_v41 = vpop.f32.mrb[59].mxu1 }
 0x2cb   : > { %v1982_v35 = vpop.eup %1981  ;;  %1418 = vst [vmem:[%s2645_s18 + $0x158] sm:$0xff] %v1354_v34  ;;  %v1170_v42 = vadd.f32 1.0, %v1980_v37  ;;  %2001 = vpow2.f32 %v1616_v30  ;;  %v922_v44 = vadd.f32 %v848_v41, %v848_v41  ;;  %v2079_v30 = vld [vmem:[%s2465_s28 + $0x1a0] sm:$0xff]  ;;  %v2080_v41 = vld [vmem:[%s2465_s28 + $0x1a8] sm:$0xff] }
 0x2cc   : > { %v1984_v49 = vpop.eup %1983  ;;  %v1355_v52 = vmul.f32 %v2071_v2, %v1982_v35  ;;  %2003 = vrcp.f32 %v1169_v38  ;;  %v1618_v53 = vmul.f32 -1.442695, %v921_v40 }
 0x2cd   : > { %v1986_v51 = vpop.eup %1985  ;;  %2005 = vrcp.f32 %v1170_v42  ;;  %v1171_v54 = vadd.f32 1.0, %v1984_v49  ;;  %v1619_v55 = vmul.f32 -1.442695, %v922_v44  ;;  %v852_v56 = vpop.f32.mrb[60].mxu1  ;;  %v2081_v44 = vld [vmem:[%s2465_s28 + $0x1b0] sm:$0xff] }
 0x2ce   : > { %v1988_v31 = vpop.eup %1987  ;;  %1419 = vst [vmem:[%s2645_s18 + $0x160] sm:$0xff] %v1355_v52  ;;  %v1356_v58 = vmul.f32 %v2072_v57, %v1986_v51  ;;  %2007 = vpow2.f32 %v1617_v23  ;;  %v923_v59 = vadd.f32 %v852_v56, %v852_v56  ;;  %v854_v43 = vpop.f32.mrb[61].mxu1  ;;  %v2083_v57 = vld [vmem:[%s2465_s28 + $0x1c0] sm:$0xff] }
 0x2cf   : > { %v1990_v60 = vpop.eup %1989  ;;  %v1357_v62 = vmul.f32 %v2073_v61, %v1988_v31  ;;  %2009 = vrcp.f32 %v1171_v54  ;;  %v924_v63 = vadd.f32 %v854_v43, %v854_v43 }
 0x2d0   : > { %v1992_v10 = vpop.eup %1991  ;;  %1420 = vst [vmem:[%s2645_s18 + $0x168] sm:$0xff] %v1356_v58  ;;  %v1358_v1 = vmul.f32 %v2074_v0, %v1990_v60  ;;  %2011 = vpow2.f32 %v1618_v53  ;;  %v1620_v3 = vmul.f32 -1.442695, %v923_v59  ;;  %v2084_v60 = vld [vmem:[%s2465_s28 + $0x1c8] sm:$0xff] }
 0x2d1   : > { %v1994_v39 = vpop.eup %1993  ;;  %1421 = vst [vmem:[%s2645_s18 + $0x170] sm:$0xff] %v1357_v62  ;;  %v1172_v6 = vadd.f32 1.0, %v1992_v10  ;;  %2013 = vpow2.f32 %v1619_v55  ;;  %v1621_v4 = vmul.f32 -1.442695, %v924_v63  ;;  %v858_v5 = vpop.f32.mrb[62].mxu1  ;;  %v2082_v55 = vld [vmem:[%s2465_s28 + $0x1b8] sm:$0xff] }
 0x2d2   : > { %v1996_v7 = vpop.eup %1995  ;;  %1422 = vst [vmem:[%s2645_s18 + $0x178] sm:$0xff] %v1358_v1  ;;  %v1173_v8 = vadd.f32 1.0, %v1994_v39  ;;  %2015 = vpow2.f32 %v1620_v3  ;;  %v925_v9 = vadd.f32 %v858_v5, %v858_v5  ;;  %v860_v11 = vpop.f32.mrb[63].mxu1  ;;  %v2085_v10 = vld [vmem:[%s2465_s28 + $0x1d0] sm:$0xff]  ;;  %v2086_v3 = vld [vmem:[%s2465_s28 + $0x1d8] sm:$0xff] }
 0x2d3   : > { %v1998_v13 = vpop.eup %1997  ;;  %v1359_v19 = vmul.f32 %v2075_v25, %v1996_v7  ;;  %2017 = vrcp.f32 %v1172_v6  ;;  %v926_v14 = vadd.f32 %v860_v11, %v860_v11  ;;  %v2087_v6 = vld [vmem:[%s2465_s28 + $0x1e0] sm:$0xff]  ;;  %v2089_v11 = vld [vmem:[%s2465_s28 + $0x1f0] sm:$0xff] }
 0x2d4   : > { %v2000_v46 = vpop.eup %1999  ;;  %v1360_v17 = vmul.f32 %v2076_v16, %v1998_v13  ;;  %2019 = vrcp.f32 %v1173_v8  ;;  %v1622_v45 = vmul.f32 -1.442695, %v925_v9  ;;  %v2088_v8 = vld [vmem:[%s2465_s28 + $0x1e8] sm:$0xff] }
 0x2d5   : > { %v2002_v18 = vpop.eup %2001  ;;  %1423 = vst [vmem:[%s2645_s18 + $0x180] sm:$0xff] %v1359_v19  ;;  %v1174_v20 = vadd.f32 1.0, %v2000_v46  ;;  %2021 = vpow2.f32 %v1621_v4  ;;  %v1623_v21 = vmul.f32 -1.442695, %v926_v14  ;;  %v2090_v19 = vld [vmem:[%s2465_s28 + $0x1f8] sm:$0xff] }
 0x2d6   : > { %v2004_v22 = vpop.eup %2003  ;;  %1424 = vst [vmem:[%s2645_s18 + $0x188] sm:$0xff] %v1360_v17  ;;  %v1175_v24 = vadd.f32 1.0, %v2002_v18  ;;  %2023 = vpow2.f32 %v1622_v45 }
 0x2d7   : > { %v2006_v15 = vpop.eup %2005  ;;  %v1361_v26 = vmul.f32 %v2077_v50, %v2004_v22  ;;  %2025 = vrcp.f32 %v1174_v20 }
 0x2d8   : > { %v2008_v27 = vpop.eup %2007  ;;  %v1362_v28 = vmul.f32 %v2078_v48, %v2006_v15  ;;  %2027 = vrcp.f32 %v1175_v24 }
 0x2d9   : > { %v2010_v29 = vpop.eup %2009  ;;  %1425 = vst [vmem:[%s2645_s18 + $0x190] sm:$0xff] %v1361_v26  ;;  %v1176_v12 = vadd.f32 1.0, %v2008_v27  ;;  %2029 = vpow2.f32 %v1623_v21 }
 0x2da   : > { %v2012_v47 = vpop.eup %2011  ;;  %1426 = vst [vmem:[%s2645_s18 + $0x198] sm:$0xff] %v1362_v28  ;;  %v1363_v32 = vmul.f32 %v2079_v30, %v2010_v29 }
 0x2db   : > { %v2014_v33 = vpop.eup %2013  ;;  %2031 = vrcp.f32 %v1176_v12  ;;  %v1177_v34 = vadd.f32 1.0, %v2012_v47 }
 0x2dc   : > { %v2016_v36 = vpop.eup %2015  ;;  %1427 = vst [vmem:[%s2645_s18 + $0x1a0] sm:$0xff] %v1363_v32  ;;  %v1178_v37 = vadd.f32 1.0, %v2014_v33 }
 0x2dd   : > { %v2018_v38 = vpop.eup %2017  ;;  %2033 = vrcp.f32 %v1177_v34  ;;  %v1179_v23 = vadd.f32 1.0, %v2016_v36 }
 0x2de   : > { %v2020_v40 = vpop.eup %2019  ;;  %v1364_v35 = vmul.f32 %v2080_v41, %v2018_v38  ;;  %2035 = vrcp.f32 %v1178_v37 }
 0x2df   : > { %v2022_v42 = vpop.eup %2021  ;;  %v1365_v49 = vmul.f32 %v2081_v44, %v2020_v40  ;;  %2037 = vrcp.f32 %v1179_v23 }
 0x2e0   : > { %v2024_v2 = vpop.eup %2023  ;;  %1428 = vst [vmem:[%s2645_s18 + $0x1a8] sm:$0xff] %v1364_v35  ;;  %v1180_v52 = vadd.f32 1.0, %v2022_v42 }
 0x2e1   : > { %v2026_v53 = vpop.eup %2025  ;;  %1429 = vst [vmem:[%s2645_s18 + $0x1b0] sm:$0xff] %v1365_v49  ;;  %v1181_v51 = vadd.f32 1.0, %v2024_v2 }
 0x2e2   : > { %v2028_v54 = vpop.eup %2027  ;;  %v1366_v56 = vmul.f32 %v2082_v55, %v2026_v53  ;;  %2039 = vrcp.f32 %v1180_v52 }
 0x2e3   : > { %v2030_v31 = vpop.eup %2029  ;;  %v1367_v58 = vmul.f32 %v2083_v57, %v2028_v54  ;;  %2041 = vrcp.f32 %v1181_v51 }
 0x2e4   : > { %1430 = vst [vmem:[%s2645_s18 + $0x1b8] sm:$0xff] %v1366_v56  ;;  %v1182_v59 = vadd.f32 1.0, %v2030_v31 }
 0x2e5   : > { %v2032_v43 = vpop.eup %2031  ;;  %1431 = vst [vmem:[%s2645_s18 + $0x1c0] sm:$0xff] %v1367_v58 }
 0x2e6   : > { %v1368_v61 = vmul.f32 %v2084_v60, %v2032_v43  ;;  %2043 = vrcp.f32 %v1182_v59 }
 0x2e7   : > { %v2034_v62 = vpop.eup %2033 }
 0x2e8   : > { %v2036_v63 = vpop.eup %2035  ;;  %1432 = vst [vmem:[%s2645_s18 + $0x1c8] sm:$0xff] %v1368_v61  ;;  %v1369_v0 = vmul.f32 %v2085_v10, %v2034_v62 }
 0x2e9   : > { %v2038_v1 = vpop.eup %2037  ;;  %v1370_v39 = vmul.f32 %v2086_v3, %v2036_v63 }
 0x2ea   : > { %1433 = vst [vmem:[%s2645_s18 + $0x1d0] sm:$0xff] %v1369_v0  ;;  %v1371_v4 = vmul.f32 %v2087_v6, %v2038_v1 }
 0x2eb   : > { %1434 = vst [vmem:[%s2645_s18 + $0x1d8] sm:$0xff] %v1370_v39 }
 0x2ec   : > { %v2040_v5 = vpop.eup %2039  ;;  %1435 = vst [vmem:[%s2645_s18 + $0x1e0] sm:$0xff] %v1371_v4 }
 0x2ed   : > { %v2042_v7 = vpop.eup %2041  ;;  %v1372_v9 = vmul.f32 %v2088_v8, %v2040_v5 }
 0x2ee   : > { %v1373_v13 = vmul.f32 %v2089_v11, %v2042_v7 }
 0x2ef   : > { %1436 = vst [vmem:[%s2645_s18 + $0x1e8] sm:$0xff] %v1372_v9 }
 0x2f0   : > { %v2044_v25 = vpop.eup %2043  ;;  %1437 = vst [vmem:[%s2645_s18 + $0x1f0] sm:$0xff] %v1373_v13 }
 0x2f1   : > { %v1374_v14 = vmul.f32 %v2090_v19, %v2044_v25 }
 0x2f3   : > { %1438 = vst [vmem:[%s2645_s18 + $0x1f8] sm:$0xff] %v1374_v14 }
 0x2f4   : > { %2190 = shalt.err (!%p2187_p2)
}
 0x2f5   : > { %s2191_s10 = scalar_lea.hbm %s2776_s27, 8192  ;;  %s2195_s26 = scalar_lea.hbm %s2827_s3, 16384 }
 0x2f6   : > { %p2192_p13 = scmp.ne.s32.totalorder %s2776_s27, %s2191_s10  ;;  %p2196_p4 = scmp.lt.u32.totalorder %s2776_s27, %s2827_s3 }
 0x2f7   : > { %p2197_p7 = scmp.lt.u32.totalorder %s2195_s26, %s2191_s10  ;;  %p2199_p11 = scmp.lt.u32.totalorder %s2191_s10, %s2776_s27 }
 0x2f8   : > { %p2193_p6 = pnand %p2192_p13, %p2841_p0 }
 0x2f9   : > { %p2198_p8 = por %p2197_p7, %p2196_p4 }
 0x2fa   : > { %p2194_p10 = pneg %p2193_p6 }
 0x2fb   : > { %p2200_p1 = por %p2199_p11, %p2198_p8 }
 0x2fd   : > { %p2201_p3 = pnand %p2200_p1, %p2194_p10 }
 0x2ff   : > { %2204 = shalt.err (!%p2201_p3)
}
 0x300   : > { %s2259_s28 = smov 256   ;;  %s2260_s18 = smov 16  }
 0x301   : > { %1724 = dma.vmem_to_hbm [thread:$0]  (%p2841_p0), %s2778_s29, 8192, %s2776_s27, %s1440_s16, %s2259_s28, %s2259_s28, %s2260_s18  }
 0x302 PF: > { %s1469_s20 = sand.u32 1, %s2235_s12   ;;  %p2842_p5 = scmp.ne.s32.totalorder %s2832_s19, 0 }
 0x303   : > { %p2843_p9 = scmp.ge.s32.totalorder %s2247_s15, 2  ;;  %s1470_s30 = scalar_lea.sflag [#allocation4], %s1469_s20 }
 0x305   : > { %p1738_p12 = pnand %p2843_p9, %p2842_p5 }
 0x307   : > { %2230 = dma.done.wait (!%p1738_p12), %s1470_s30, 8192  }
 0x308   : > { %2232 = vsyncadd (!%p1738_p12), %s1470_s30, 4294959104  ;;  %p17_p2 = scmp.ge.s32.totalorder %s2394_s6, 4   ;;  %s2844_s12 = smov %s2239_s13 }
 0x309   : > { %s2845_s13 = smov %s2243_s14  ;;  %s2846_s14 = smov %s2403_s9 }
 0x30a   : > { %s2847_s15 = smov %s2394_s6  ;;  %19 = sbr.rel (!%p17_p2) target bundleno = 6 (0x6), region = 85 }
 0x311   :  { %1475 = vsyncpa [#allocation3], 1 }
 0x312   :  { %1477 = vsyncpa [#allocation3 + $0x1], 1 }
 0x313   :  { %1478 = vsyncpa [#allocation6], 1 }
 0x314   :  { %1479 = vsyncpa [#allocation4], 1 }
 0x315   :  { %1481 = vsyncpa [#allocation4 + $0x1], 1 }

</bundles_post_ra>
